<compile_context>
chip_gen: v5e
topology: v5e:2x2
jax: 0.10.0
libtpu: 0.0.40
codegen_flags: <defaults>
</compile_context>

<pallas_src>
from functools import partial

import jax
import jax.numpy as jnp
from jax.experimental import pallas as pl
from jax.experimental.pallas import tpu as pltpu

_HIGH = jax.lax.Precision.HIGHEST


# ----------------------------------------------------------------------------
# Fused single-pass kernel: one (nb, C, L) block per grid step.
# ----------------------------------------------------------------------------
def _cbam_kernel(x_ref, w1_ref, w2_ref, o_ref):
    x = x_ref[...]                                   # (nb, C, L), native dtype
    nb, C, L = x.shape
    H = w1_ref.shape[0]

    # ---- avg branch: fold W1 into the pooling so the L-reduction runs on the MXU.
    w1x = w1_ref[...].astype(x.dtype)                # (H, C), tiny, VMEM resident
    w1b = jnp.broadcast_to(w1x[None], (nb, H, C))    # once per grid step
    pre = jnp.einsum('nhc,ncl->nhl', w1b, x,
                     preferred_element_type=jnp.float32,
                     precision=_HIGH)                # (nb, H, L) f32 on MXU
    h_avg = jnp.maximum(jnp.sum(pre, axis=-1) * (1.0 / L), 0.0)        # (nb, H)

    # ---- max branch: max stays on the lane-reduce path, FC on the MXU.
    mx = jnp.max(x, axis=-1).astype(jnp.float32)     # (nb, C)
    w1f = w1_ref[...].astype(jnp.float32)            # (H, C)
    h_max = jnp.maximum(
        jax.lax.dot_general(mx, w1f, (((1,), (1,)), ((), ())),
                            preferred_element_type=jnp.float32,
                            precision=_HIGH), 0.0)                     # (nb, H)

    # Second 1x1 conv is linear, so fc(avg) + fc(max) = W2 @ (h_avg + h_max).
    w2f = w2_ref[...].astype(jnp.float32)            # (C, H)
    out = jax.lax.dot_general(h_avg + h_max, w2f, (((1,), (1,)), ((), ())),
                              preferred_element_type=jnp.float32,
                              precision=_HIGH)                          # (nb, C)
    gate = jax.nn.sigmoid(out)                       # (nb, C) f32

    # Re-read x_ref so the first load's live range ends before the matmuls;
    # multiply in x's dtype so bf16 inputs never create a full-block f32 temp.
    o_ref[...] = (gate.astype(o_ref.dtype)[:, :, None] * x_ref[...]).astype(o_ref.dtype)


# ----------------------------------------------------------------------------
# L-tiled gate kernel (fallback for very large C*L): grid = (batch, L blocks).
# ----------------------------------------------------------------------------
def _make_reduce_kernel(total_l):
    def _reduce_kernel(x_ref, w1_ref, w2_ref, gate_ref, hsum_sc, cmax_sc):
        li = pl.program_id(1)

        @pl.when(li == 0)
        def _():
            hsum_sc[...] = jnp.zeros_like(hsum_sc)
            cmax_sc[...] = jnp.full_like(cmax_sc, -jnp.inf)

        x = x_ref[...]                               # (1, C, lblk)
        C = x.shape[1]
        H = w1_ref.shape[0]

        w1x = w1_ref[...].astype(x.dtype)
        w1b = jnp.broadcast_to(w1x[None], (1, H, C))
        pre = jnp.einsum('nhc,ncl->nhl', w1b, x,
                         preferred_element_type=jnp.float32,
                         precision=_HIGH)            # (1, H, lblk)
        hsum_sc[...] += jnp.sum(pre, axis=-1)        # (1, H) f32 accumulator
        cmax_sc[...] = jnp.maximum(cmax_sc[...],
                                   jnp.max(x, axis=-1).astype(jnp.float32))  # (1, C)

        @pl.when(li == pl.num_programs(1) - 1)
        def _():
            w1f = w1_ref[...].astype(jnp.float32)
            w2f = w2_ref[...].astype(jnp.float32)
            h_avg = jnp.maximum(hsum_sc[...] * (1.0 / total_l), 0.0)    # (1, H)
            h_max = jnp.maximum(
                jax.lax.dot_general(cmax_sc[...], w1f, (((1,), (1,)), ((), ())),
                                    preferred_element_type=jnp.float32,
                                    precision=_HIGH), 0.0)              # (1, H)
            out = jax.lax.dot_general(h_avg + h_max, w2f, (((1,), (1,)), ((), ())),
                                      preferred_element_type=jnp.float32,
                                      precision=_HIGH)                  # (1, C)
            g = jax.nn.sigmoid(out)                                     # (1, C)
            gate_ref[...] = jnp.broadcast_to(g[:, None, :], gate_ref.shape)

    return _reduce_kernel


# ----------------------------------------------------------------------------
# Block-size selection (generation aware).
# ----------------------------------------------------------------------------
def _tpu_num_tensorcores():
    """2 for chips whose TensorCores share a chip (v7x, v4/v5p megacore), else 1."""
    try:
        kind = jax.devices()[0].device_kind.lower().replace(" ", "")
    except Exception:
        return 1
    if any(tag in kind for tag in ("v7", "tpu7", "v4", "v5p")):
        return 2
    return 1


def _pick_batch_block(n, per_batch_bytes, target_bytes, num_cores):
    """Batch elements per grid step: big blocks, divisor of N, 2-TC friendly."""
    nb_cap = max(1, min(n, target_bytes // max(1, per_batch_bytes)))
    if num_cores >= 2 and n >= 2:
        # Keep >= 2 grid steps only when there is a second TensorCore to feed.
        nb_cap = min(nb_cap, max(1, n // 2))
    divisors = [d for d in range(1, nb_cap + 1) if n % d == 0]
    if num_cores >= 2:
        even = [d for d in divisors if (n // d) % 2 == 0]
        if even:
            return max(even)       # balanced sharding across both cores
    return max(divisors)


def _pick_l_block(total_l, c, itemsize, cap_bytes):
    """Largest lane-aligned (multiple-of-128) divisor of L fitting the cap."""
    max_l = cap_bytes // max(1, c * itemsize)
    best = None
    d = 128
    while d <= min(total_l, max_l):
        if total_l % d == 0:
            best = d
        d += 128
    if best is None and total_l <= max_l:
        best = total_l
    return best


# ----------------------------------------------------------------------------
# Wrappers.
# ----------------------------------------------------------------------------
def cbam_reference(x, w1, w2):
    """Pure-JAX reference mirroring the PyTorch forward (f32-accurate matmuls)."""
    avg = jnp.mean(x, axis=-1, keepdims=True)             # (N, C, 1)
    mx = jnp.max(x, axis=-1, keepdims=True)               # (N, C, 1)

    def fc(v):
        h = jnp.einsum('hc,ncl->nhl', w1, v, precision=_HIGH)
        h = jnp.maximum(h, 0.0)
        return jnp.einsum('ch,nhl->ncl', w2, h, precision=_HIGH)

    gate = jax.nn.sigmoid(fc(avg) + fc(mx))               # (N, C, 1)
    return gate * x


def _forward_fused(x, w1, w2, nb, vmem_limit):
    N, C, L = x.shape
    H = w1.shape[0]
    return pl.pallas_call(
        _cbam_kernel,
        out_shape=jax.ShapeDtypeStruct((N, C, L), x.dtype),
        grid_spec=pltpu.PrefetchScalarGridSpec(
            num_scalar_prefetch=0,
            grid=(N // nb,),
            in_specs=[
                pl.BlockSpec((nb, C, L), lambda b: (b, 0, 0)),   # x block
                pl.BlockSpec((H, C), lambda b: (0, 0)),          # W1 (resident)
                pl.BlockSpec((C, H), lambda b: (0, 0)),          # W2 (resident)
            ],
            out_specs=pl.BlockSpec((nb, C, L), lambda b: (b, 0, 0)),
        ),
        compiler_params=pltpu.CompilerParams(
            dimension_semantics=("parallel",),
            vmem_limit_bytes=vmem_limit,
        ),
    )(x, w1, w2)


def _forward_l_tiled(x, w1, w2, lblk, vmem_limit):
    N, C, L = x.shape
    H = w1.shape[0]
    gate_pad = pl.pallas_call(
        _make_reduce_kernel(L),
        out_shape=jax.ShapeDtypeStruct((N, 8, C), jnp.float32),
        grid_spec=pltpu.PrefetchScalarGridSpec(
            num_scalar_prefetch=0,
            grid=(N, L // lblk),
            in_specs=[
                pl.BlockSpec((1, C, lblk), lambda b, li: (b, 0, li)),
                pl.BlockSpec((H, C), lambda b, li: (0, 0)),
                pl.BlockSpec((C, H), lambda b, li: (0, 0)),
            ],
            out_specs=pl.BlockSpec((1, 8, C), lambda b, li: (b, 0, 0)),
            scratch_shapes=[
                pltpu.VMEM((1, H), jnp.float32),   # running sum of W1 @ x over L
                pltpu.VMEM((1, C), jnp.float32),   # running channel max over L
            ],
        ),
        compiler_params=pltpu.CompilerParams(
            dimension_semantics=("parallel", "arbitrary"),
            vmem_limit_bytes=vmem_limit,
        ),
    )(x, w1, w2)
    gate = gate_pad[:, 0, :]                               # (N, C) f32
    # The remaining gate*x is a trivially memory-bound broadcast-multiply; XLA
    # already runs it at the HBM roofline, so no second Pallas pass is needed.
    return (gate.astype(x.dtype)[:, :, None] * x).astype(x.dtype)


@partial(jax.jit, static_argnames=("max_slab_bytes", "target_block_bytes"))
def cbam_forward(x, w1, w2, *, max_slab_bytes=None, target_block_bytes=None):
    """x: (N, C, L); w1: (C//r, C); w2: (C, C//r). Returns (N, C, L)."""
    N, C, L = x.shape
    H = w1.shape[0]
    assert w1.shape == (H, C) and w2.shape == (C, H)
    itemsize = x.dtype.itemsize

    num_cores = _tpu_num_tensorcores()
    if target_block_bytes is None:
        target_block_bytes = (6 << 20) if num_cores >= 2 else (4 << 20)
    if max_slab_bytes is None:
        max_slab_bytes = 8 << 20
    vmem_limit = (48 << 20) if num_cores >= 2 else (64 << 20)

    per_batch = C * L * itemsize
    if per_batch <= max_slab_bytes:
        nb = _pick_batch_block(N, per_batch, target_block_bytes, num_cores)
        return _forward_fused(x, w1, w2, nb, vmem_limit)

    cap = max(min(target_block_bytes, max_slab_bytes), C * 128 * itemsize)
    lblk = _pick_l_block(L, C, itemsize, cap)
    if lblk is not None:
        return _forward_l_tiled(x, w1, w2, lblk, vmem_limit)

    # TODO(synk): no lane-aligned L tiling exists for this shape; use XLA fallback.
    return cbam_reference(x, w1, w2).astype(x.dtype)


# ----------------------------------------------------------------------------
# Self-test.
# ----------------------------------------------------------------------------
if __name__ == "__main__":
    def _check(got, ref):
        assert got.shape == ref.shape and got.dtype == ref.dtype
        # Tolerance accounts for MXU f32 emulation and the (algebraically exact)
        # reordering of W1 before the mean relative to the XLA einsum reference.
        assert jnp.allclose(got, ref, atol=1e-3, rtol=1e-3), (
            float(jnp.max(jnp.abs(got - ref))))

    # Small shapes consistent with the module: Conv1d input is (N, C, L).
    N, C, L = 4, 64, 128
    reduction_ratio = 16
    H = C // reduction_ratio

    key = jax.random.PRNGKey(0)
    kx, k1, k2 = jax.random.split(key, 3)
    x = jax.random.normal(kx, (N, C, L), dtype=jnp.float32)
    # Deterministic synthetic weights for the two bias-free 1x1 Conv1d layers.
    w1 = jax.random.normal(k1, (H, C), dtype=jnp.float32) * (1.0 / C) ** 0.5
    w2 = jax.random.normal(k2, (C, H), dtype=jnp.float32) * (1.0 / H) ** 0.5

    # Primary fused single-pass path.
    out = jax.block_until_ready(cbam_forward(x, w1, w2))
    _check(out, cbam_reference(x, w1, w2))

    # Exercise the L-tiled (two-pass) path by forcing a tiny slab cap.
    x2 = jax.random.normal(kx, (2, C, 256), dtype=jnp.float32)
    out2 = jax.block_until_ready(cbam_forward(x2, w1, w2, max_slab_bytes=48 * 1024))
    _check(out2, cbam_reference(x2, w1, w2))

    print("KERNEL_OK")
</pallas_src>

<mosaic_0001>
module attributes {stable_mosaic.version = 11 : i64} {
  func.func @_cbam_kernel(%arg0: i32, %arg1: memref<4x64x128xf32, #tpu.memory_space<vmem>>, %arg2: memref<4x64xf32, #tpu.memory_space<vmem>>, %arg3: memref<64x4xf32, #tpu.memory_space<vmem>>, %arg4: memref<4x64x128xf32, #tpu.memory_space<vmem>>) attributes {dimension_semantics = [#tpu.dimension_semantics<parallel>], iteration_bounds = array<i64: 1>, scalar_prefetch = 0 : i64, scratch_operands = 0 : i64, tpu.core_type = #tpu.core_type<tc>, window_params = [{transform_indices = @transform_0, window_bounds = array<i64: 4, 64, 128>}, {pipeline_mode = #tpu.pipeline_mode<synchronous>, transform_indices = @transform_1, window_bounds = array<i64: 4, 64>}, {pipeline_mode = #tpu.pipeline_mode<synchronous>, transform_indices = @transform_2, window_bounds = array<i64: 64, 4>}, {transform_indices = @transform_3, window_bounds = array<i64: 4, 64, 128>}]} {
    %c0 = arith.constant 0 : index
    %c0_0 = arith.constant 0 : index
    %c0_1 = arith.constant 0 : index
    %0 = vector.load %arg1[%c0, %c0_0, %c0_1] : memref<4x64x128xf32, #tpu.memory_space<vmem>>, vector<4x64x128xf32>
    %c0_2 = arith.constant 0 : index
    %c0_3 = arith.constant 0 : index
    %1 = vector.load %arg2[%c0_2, %c0_3] : memref<4x64xf32, #tpu.memory_space<vmem>>, vector<4x64xf32>
    %2 = vector.shape_cast %1 : vector<4x64xf32> to vector<1x4x64xf32>
    %3 = vector.shape_cast %2 : vector<1x4x64xf32> to vector<1x4x64xf32>
    %4 = vector.broadcast %3 : vector<1x4x64xf32> to vector<4x4x64xf32>
    "tpu.trace_start"() <{level = 10 : i32, message = "nhc,ncl->nhl"}> : () -> ()
    %cst = arith.constant dense<0.000000e+00> : vector<4x4x128xf32>
    %5 = tpu.matmul %4, %0, %cst {dimension_numbers = #tpu.dot_dimension_numbers<[2], [1], [1], [2], [0, 0, 0, 1, 1, 2], [0], [0]>, precision = #tpu.contract_precision<fp32>} : vector<4x4x64xf32>, vector<4x64x128xf32>, vector<4x4x128xf32> -> vector<4x4x128xf32>
    "tpu.trace_stop"() : () -> ()
    %cst_4 = arith.constant dense<0.000000e+00> : vector<4x4xf32>
    %6 = vector.multi_reduction <add>, %5, %cst_4 [2] : vector<4x4x128xf32> to vector<4x4xf32>
    %cst_5 = arith.constant 7.812500e-03 : f32
    %7 = vector.broadcast %cst_5 : f32 to vector<4x4xf32>
    %8 = arith.mulf %6, %7 : vector<4x4xf32>
    %cst_6 = arith.constant 0.000000e+00 : f32
    %9 = vector.broadcast %cst_6 : f32 to vector<4x4xf32>
    %10 = arith.maximumf %8, %9 : vector<4x4xf32>
    %cst_7 = arith.constant dense<0xFF800000> : vector<4x64xf32>
    %11 = vector.multi_reduction <maximumf>, %0, %cst_7 [2] : vector<4x64x128xf32> to vector<4x64xf32>
    %c0_8 = arith.constant 0 : index
    %c0_9 = arith.constant 0 : index
    %12 = vector.load %arg2[%c0_8, %c0_9] : memref<4x64xf32, #tpu.memory_space<vmem>>, vector<4x64xf32>
    %cst_10 = arith.constant dense<0.000000e+00> : vector<4x4xf32>
    %13 = tpu.matmul %11, %12, %cst_10 {dimension_numbers = #tpu.dot_dimension_numbers<[1], [1], [0], [0], [0, 0, 1, 0], [], []>, precision = #tpu.contract_precision<fp32>} : vector<4x64xf32>, vector<4x64xf32>, vector<4x4xf32> -> vector<4x4xf32>
    %cst_11 = arith.constant 0.000000e+00 : f32
    %14 = vector.broadcast %cst_11 : f32 to vector<4x4xf32>
    %15 = arith.maximumf %13, %14 : vector<4x4xf32>
    %c0_12 = arith.constant 0 : index
    %c0_13 = arith.constant 0 : index
    %16 = vector.load %arg3[%c0_12, %c0_13] : memref<64x4xf32, #tpu.memory_space<vmem>>, vector<64x4xf32>
    %17 = arith.addf %10, %15 : vector<4x4xf32>
    %cst_14 = arith.constant dense<0.000000e+00> : vector<4x64xf32>
    %18 = tpu.matmul %17, %16, %cst_14 {dimension_numbers = #tpu.dot_dimension_numbers<[1], [1], [0], [0], [0, 0, 1, 0], [], []>, precision = #tpu.contract_precision<fp32>} : vector<4x4xf32>, vector<64x4xf32>, vector<4x64xf32> -> vector<4x64xf32>
    %19 = arith.negf %18 : vector<4x64xf32>
    %20 = math.exp %19 : vector<4x64xf32>
    %cst_15 = arith.constant 1.000000e+00 : f32
    %21 = vector.broadcast %cst_15 : f32 to vector<4x64xf32>
    %22 = arith.addf %21, %20 : vector<4x64xf32>
    %23 = arith.divf %21, %22 : vector<4x64xf32>
    %24 = vector.shape_cast %23 : vector<4x64xf32> to vector<4x64x1xf32>
    %c0_16 = arith.constant 0 : index
    %c0_17 = arith.constant 0 : index
    %c0_18 = arith.constant 0 : index
    %25 = vector.load %arg1[%c0_16, %c0_17, %c0_18] : memref<4x64x128xf32, #tpu.memory_space<vmem>>, vector<4x64x128xf32>
    %26 = vector.broadcast %24 : vector<4x64x1xf32> to vector<4x64x128xf32>
    %27 = arith.mulf %26, %25 : vector<4x64x128xf32>
    %c0_19 = arith.constant 0 : index
    %c0_20 = arith.constant 0 : index
    %c0_21 = arith.constant 0 : index
    %28 = vector.load %arg4[%c0_19, %c0_20, %c0_21] : memref<4x64x128xf32, #tpu.memory_space<vmem>>, vector<4x64x128xf32>
    tpu.vector_store %arg4[%c0_19, %c0_20, %c0_21], %27 {strides = array<i32>} : memref<4x64x128xf32, #tpu.memory_space<vmem>>, vector<4x64x128xf32>,
    return
  }
  func.func @transform_0(%arg0: i32) -> (i32, i32, i32) {
    %c0_i32 = arith.constant 0 : i32
    %c0_i32_0 = arith.constant 0 : i32
    %c0_i32_1 = arith.constant 0 : i32
    return %arg0, %c0_i32, %c0_i32_0 : i32, i32, i32
  }
  func.func @transform_1(%arg0: i32) -> (i32, i32) {
    %c0_i32 = arith.constant 0 : i32
    %c0_i32_0 = arith.constant 0 : i32
    %c0_i32_1 = arith.constant 0 : i32
    return %c0_i32, %c0_i32_0 : i32, i32
  }
  func.func @transform_2(%arg0: i32) -> (i32, i32) {
    %c0_i32 = arith.constant 0 : i32
    %c0_i32_0 = arith.constant 0 : i32
    %c0_i32_1 = arith.constant 0 : i32
    return %c0_i32, %c0_i32_0 : i32, i32
  }
  func.func @transform_3(%arg0: i32) -> (i32, i32, i32) {
    %c0_i32 = arith.constant 0 : i32
    %c0_i32_0 = arith.constant 0 : i32
    %c0_i32_1 = arith.constant 0 : i32
    return %arg0, %c0_i32, %c0_i32_0 : i32, i32, i32
  }
}

</mosaic_0001>

<bundles_post_ra>
// kernel: cbam_forward.1
= control target key start
LH: loop header
LB: loop body
LE: loop exit
PB: predicated region body
PF: predicated region fallthrough
CT: control target
= control target key end

     0   :  { %8 = vsyncpa [#allocation3], 0  ;;  %s3091_s0 = inlined_call_operand.hbm [shape: f32[4,64,128], index: 0, kind: input, shape index: {}]   ;;  %s3092_s1 = inlined_call_operand.vmem [shape: f32[4,64], index: 1, kind: input, shape index: {}]   ;;  %s3093_s2 = inlined_call_operand.vmem [shape: f32[64,4], index: 2, kind: input, shape index: {}]   ;;  %s3094_s3 = inlined_call_operand.hbm [shape: f32[4,64,128], index: 3, kind: output, shape index: {}]  }
   0x1   :  { %9 = vsyncpa [#allocation4], 0  ;;  %s14_s14 = sshll.u32 %s3091_s0, 4  ;;  %s2131_s15 = smov [#allocation2]   ;;  %s15_s14 = int_to_ptr.hbm [resolvable:$true] %s14_s14 }
   0x2   :  { %s16_s16 = sshll.u32 %s2131_s15, 4  ;;  %s2132_s17 = smov 128   ;;  %s17_s16 = int_to_ptr.vmem [resolvable:$true] %s16_s16 }
   0x3   :  { %s2133_s18 = smov 8  }
   0x4   :  { %22 = dma.hbm_to_vmem [thread:$0]  %s15_s14, 4096, %s17_s16, [#allocation3], %s2132_s17, %s2132_s17, %s2133_s18  }
   0x5   :  { %2127 = dma.done.wait [#allocation3], 4096  }
   0x6   :  { %2128 = vsyncadd [#allocation3], 4294963200  ;;  %v2162_v0 = vld [vmem:[#allocation2 + $0x40] sm:$0xff]  ;;  %v2164_v1 = vld [vmem:[#allocation2 + $0x10] sm:$0xff]  ;;  %vm64_vm0 = vcmask 523264   ;;  %vm1139_vm1 = vcmask 130112  }
   0x7   :  { %v2166_v2 = vld [vmem:[#allocation2] sm:$0xff]  ;;  %1053 = vmax.xlane.f32.xlu1 %v2162_v0  ;;  %1041 = vmax.xlane.f32.xlu2 %v2164_v1  ;;  %v2171_v3 = vld [vmem:[#allocation2 + $0x48] sm:$0xff]  ;;  %v2173_v4 = vld [vmem:[#allocation2 + $0x50] sm:$0xff]  ;;  %v2233_v28 = vand.u32 4294901760, %v2164_v1  ;;  %v2296_v46 = vand.u32 4294901760, %v2162_v0  ;;  %vm1143_vm2 = vcmask 195712  }
   0x8   :  { %1037 = vmax.xlane.f32.xlu0 %v2166_v2  ;;  %v2175_v5 = vld [vmem:[#allocation2 + $0x8] sm:$0xff]  ;;  %v34_v7 = vld [vmem:[#allocation2 + $0x18] sm:$0xff]  ;;  %v2182_v8 = vld [vmem:[#allocation2 + $0x80] sm:$0xff]  ;;  %v2253_v34 = vand.u32 4294901760, %v2166_v2  ;;  %v2267_v37 = vand.u32 4294901760, %v2173_v4  ;;  %v2303_v48 = vand.u32 4294901760, %v2171_v3 }
   0x9   :  { %v2180_v6 = vld [vmem:[#allocation2 + $0x88] sm:$0xff]  ;;  %v2186_v9 = vld [vmem:[#allocation2 + $0x90] sm:$0xff]  ;;  %v2188_v10 = vld [vmem:[#allocation2 + $0xc0] sm:$0xff]  ;;  %v2225_v25 = vand.u32 4294901760, %v34_v7  ;;  %v2244_v32 = vand.u32 4294901760, %v2175_v5  ;;  %v2290_v44 = vsub.f32 %v2164_v1, %v2233_v28  ;;  %vm1147_vm3 = vcmask 261312  }
   0xa   :  { %v2190_v11 = vld [vmem:[#allocation2 + $0x58] sm:$0xff]  ;;  %v2200_v14 = vld [vmem:[#allocation2 + $0x30] sm:$0xff]  ;;  %v35_v16 = vld [vmem:[#allocation2 + $0x20] sm:$0xff]  ;;  %v2300_v47 = vsub.f32 %v2166_v2, %v2253_v34  ;;  %vm1151_vm4 = vcmask 326912   ;;  %vm1155_vm5 = vcmask 392512   ;;  %vm1159_vm6 = vcmask 458112  }
   0xb   :  { %v2195_v12 = vld [vmem:[#allocation2 + $0x38] sm:$0xff]  ;;  %v2203_v15 = vand.u32 4294901760, %v2200_v14  ;;  %v2206_v17 = vld [vmem:[#allocation2 + $0x60] sm:$0xff]  ;;  %v2208_v18 = vld [vmem:[#allocation2 + $0xc8] sm:$0xff]  ;;  %v2216_v22 = vand.u32 4294901760, %v35_v16  ;;  %v2258_v35 = vand.u32 4294901760, %v2190_v11  ;;  %v2276_v39 = vsub.f32 %v34_v7, %v2225_v25 }
   0xc   :  { %v2198_v13 = vand.u32 4294901760, %v2195_v12  ;;  %v36_v19 = vld [vmem:[#allocation2 + $0x28] sm:$0xff]  ;;  %v2214_v21 = vld [vmem:[#allocation2 + $0x78] sm:$0xff]  ;;  %v2223_v24 = vld [vmem:[#allocation2 + $0x70] sm:$0xff]  ;;  %v2249_v33 = vand.u32 4294901760, %v2206_v17  ;;  %v2313_v51 = vsub.f32 %v2175_v5, %v2244_v32  ;;  %v3096_v58 = vand.u32 4294901760, %v2290_v44 }
   0xd   :  { %v2211_v20 = vand.u32 4294901760, %v36_v19  ;;  %v2220_v23 = vand.u32 4294901760, %v2214_v21  ;;  %v2228_v26 = vand.u32 4294901760, %v2223_v24  ;;  %v44_v27 = vld [vmem:[#allocation2 + $0x68] sm:$0xff]  ;;  %v2235_v29 = vld [vmem:[#allocation2 + $0xd0] sm:$0xff]  ;;  %v2241_v31 = vld [vmem:[#allocation2 + $0x98] sm:$0xff]  ;;  %v2271_v38 = vsub.f32 %v2200_v14, %v2203_v15 }
   0xe   :  { %77 = vmatpush.msra.mxu0 %v2198_v13  ;;  %v2237_v30 = vand.u32 4294901760, %v44_v27  ;;  %v2262_v36 = vsub.f32 %v2195_v12, %v2198_v13  ;;  %v2279_v40 = vsub.f32 %v35_v16, %v2216_v22  ;;  %v2284_v42 = vld [vmem:[#allocation2 + $0xa0] sm:$0xff]  ;;  %v2286_v43 = vld [vmem:[#allocation2 + $0xd8] sm:$0xff]  ;;  %v3095_v54 = vand.u32 4294901760, %v2276_v39  ;;  %v2346_v2 = vld [vmem:[#allocation2 + $0xa8] sm:$0xff]  ;;  %s2017_s13 = sshll.u32 %s3094_s3, 4  ;;  %s2018_s13 = int_to_ptr.hbm [resolvable:$true] %s2017_s13 }
   0xf   :  { %1055 = vmax.xlane.f32.xlu1 %v2171_v3  ;;  %1057 = vmax.xlane.f32.xlu2 %v2173_v4  ;;  %v2282_v41 = vsub.f32 %v36_v19, %v2211_v20  ;;  %v3100_v50 = vand.u32 4294901760, %v2271_v38  ;;  %v2329_v59 = vsub.f32 %v2223_v24, %v2228_v26  ;;  %v2333_v60 = vsub.f32 %v2214_v21, %v2220_v23  ;;  %v63_v1 = vld [vmem:[%s3092_s1] sm:$0xf] }
  0x10   :  { %1039 = vmax.xlane.f32.xlu0 %v2175_v5  ;;  %79 = vmatpush.msra.mxu0 %v2203_v15  ;;  %v3101_v45 = vand.u32 4294901760, %v2262_v36  ;;  %v3097_v53 = vand.u32 4294901760, %v2279_v40  ;;  %v2320_v55 = vsub.f32 %v44_v27, %v2237_v30  ;;  %vm1163_vm7 = vcmask 523712  }
  0x11   :  { %314 = vmatpush.msra.mxu2 %v2220_v23  ;;  %v3098_v52 = vand.u32 4294901760, %v2282_v41  ;;  %v118_v57 = vsub.f32 %v2271_v38, %v3100_v50  ;;  %vm1210_vm8 = vcmask 1041409   ;;  %vm1212_vm9 = vcmask 1042434  }
  0x12   :  { %81 = vmatpush.msra.mxu0 %v2211_v20  ;;  %v112_v49 = vsub.f32 %v2262_v36, %v3101_v45  ;;  %v130_v62 = vsub.f32 %v2279_v40, %v3097_v53  ;;  %v2384_v45 = vld [vmem:[#allocation2 + $0xe0] sm:$0xff]  ;;  %vm1214_vm10 = vcmask 1043459   ;;  %vm1016_vm11 = vcmask 1043456  }
  0x13   :  { %316 = vmatpush.msra.mxu2 %v2228_v26  ;;  %v124_v61 = vsub.f32 %v2282_v41, %v3098_v52  ;;  %v119_v63 = vand.u32 4294901760, %v118_v57  ;;  %v348_v57 = vand.u32 4294901760, %v2333_v60  ;;  %vm1436_vm12 = vcmask 31744  }
  0x14   :  { %83 = vmatpush.msra.mxu0 %v2216_v22  ;;  %v113_v56 = vand.u32 4294901760, %v112_v49  ;;  %v153_v49 = vand.u32 4294901760, %v2300_v47 }
  0x15   :  { %318 = vmatpush.msra.mxu2 %v2237_v30  ;;  %v125_v5 = vand.u32 4294901760, %v124_v61  ;;  %v354_v61 = vand.u32 4294901760, %v2329_v59 }
  0x16   :  { %85 = vmatpush.msra.mxu0 %v2225_v25  ;;  %114 = vmatpush.msra.mxu1 %v113_v56  ;;  %v66_v56 = vsel %vm64_vm0, %v63_v1, 0 }
  0x17   :  { %1071 = vmax.xlane.f32.xlu1 %v2180_v6  ;;  %1043 = vmax.xlane.f32.xlu2 %v34_v7  ;;  %v136_v7 = vsub.f32 %v2276_v39, %v3095_v54  ;;  %v360_v54 = vand.u32 4294901760, %v2320_v55  ;;  %v355_v53 = vsub.f32 %v2329_v59, %v354_v61 }
  0x18   :  { %1069 = vmax.xlane.f32.xlu0 %v2182_v8  ;;  %87 = vmatpush.msra.mxu0 %v2233_v28 }
  0x19   :  { %320 = vmatpush.msra.mxu2 %v2249_v33  ;;  %120 = vmatpush.msra.mxu1 %v119_v63  ;;  %v137_v63 = vand.u32 4294901760, %v136_v7  ;;  %v361_v52 = vsub.f32 %v2320_v55, %v360_v54 }
  0x1a   :  { %89 = vmatpush.msra.mxu0 %v2244_v32 }
  0x1b   :  { %322 = vmatpush.msra.mxu2 %v2258_v35  ;;  %126 = vmatpush.msra.mxu1 %v125_v5  ;;  %v154_v5 = vsub.f32 %v2300_v47, %v153_v49 }
  0x1c   :  { %91 = vmatpush.msra.mxu0 %v2253_v34 }
  0x1d   :  { %324 = vmatpush.msra.mxu2 %v2267_v37 }
  0x1e   :  { %172 = vmatpush.msrb.mxu0 %v2262_v36 }
  0x1f   :  { %1073 = vmax.xlane.f32.xlu1 %v2186_v9  ;;  %1085 = vmax.xlane.f32.xlu2 %v2188_v10 }
  0x20   :  { %1059 = vmax.xlane.f32.xlu0 %v2190_v11  ;;  %175 = vmatpush.msrb.mxu0 %v2271_v38 }
  0x21   :  { %326 = vmatpush.msra.mxu2 %v2303_v48 }
  0x22   :  { %178 = vmatpush.msrb.mxu0 %v2282_v41 }
  0x23   :  { %328 = vmatpush.msra.mxu2 %v2296_v46 }
  0x24   :  { %181 = vmatpush.msrb.mxu0 %v2279_v40 }
  0x25   :  { %479 = vmatpush.msrb.mxu2 %v348_v57 }
  0x26   :  { %184 = vmatpush.msrb.mxu0 %v2276_v39 }
  0x27   :  { %1045 = vmax.xlane.f32.xlu1 %v35_v16  ;;  %1061 = vmax.xlane.f32.xlu2 %v2206_v17  ;;  %v3099_v16 = vand.u32 4294901760, %v2313_v51 }
  0x28   :  { %1087 = vmax.xlane.f32.xlu0 %v2208_v18  ;;  %187 = vmatpush.msrb.mxu0 %v2290_v44 }
  0x29   :  { %v148_v1 = vsub.f32 %v2313_v51, %v3099_v16  ;;  %v356_v16 = vand.u32 4294901760, %v355_v53  ;;  %483 = vmatpush.msrb.mxu2 %v354_v61  ;;  %v2419_v61 = vld [vmem:[#allocation2 + $0xf8] sm:$0xff] }
  0x2a   :  { %190 = vmatpush.msrb.mxu0 %v2313_v51 }
  0x2b   :  { %487 = vmatpush.msrb.mxu2 %v360_v54  ;;  %v2403_v54 = vld [vmem:[#allocation2 + $0xb0] sm:$0xff] }
  0x2c   :  { %193 = vmatpush.msrb.mxu0 %v2300_v47 }
  0x2f   :  { %1089 = vmax.xlane.f32.xlu1 %v2235_v29  ;;  %1047 = vmax.xlane.f32.xlu2 %v36_v19  ;;  %v131_v19 = vand.u32 4294901760, %v130_v62  ;;  %v2364_v62 = vand.u32 4294901760, %v66_v56 }
  0x30   :  { %1075 = vmax.xlane.f32.xlu0 %v2241_v31 }
  0x31   :  { %132 = vmatpush.msra.mxu1 %v131_v19 }
  0x33   :  { %138 = vmatpush.msra.mxu1 %v137_v63  ;;  %v371_v63 = vsub.f32 %v2190_v11, %v2258_v35 }
  0x37   :  { %1077 = vmax.xlane.f32.xlu1 %v2284_v42  ;;  %1091 = vmax.xlane.f32.xlu2 %v2286_v43 }
  0x38   :  { %1063 = vmax.xlane.f32.xlu0 %v44_v27  ;;  %v142_v27 = vsub.f32 %v2290_v44, %v3096_v58  ;;  %v349_v58 = vsub.f32 %v2333_v60, %v348_v57  ;;  %v155_v57 = vand.u32 4294901760, %v154_v5  ;;  %v383_v5 = vsub.f32 %v2171_v3, %v2303_v48 }
  0x3a   :  { %v350_v7 = vand.u32 4294901760, %v349_v58  ;;  %v3104_v58 = vand.u32 4294901760, %v2262_v36  ;;  %v3107_v36 = vand.u32 4294901760, %v2279_v40  ;;  %v3109_v40 = vand.u32 4294901760, %v2290_v44 }
  0x3b   :  { %v372_v44 = vand.u32 4294901760, %v371_v63 }
  0x3c   :  { %351 = vmatpush.msra.mxu3 %v350_v7 }
  0x3e   :  { %357 = vmatpush.msra.mxu3 %v356_v16  ;;  %v3106_v16 = vand.u32 4294901760, %v2282_v41  ;;  %v3108_v41 = vand.u32 4294901760, %v2276_v39 }
  0x3f   :  { %1065 = vmax.xlane.f32.xlu1 %v2223_v24  ;;  %1079 = vmax.xlane.f32.xlu2 %v2346_v2  ;;  %v2374_v24 = vsub.f32 %v66_v56, %v2364_v62  ;;  %v149_v56 = vand.u32 4294901760, %v148_v1  ;;  %v2424_v1 = vld [vmem:[#allocation2 + $0xf0] sm:$0xff] }
  0x40   :  { %1049 = vmax.xlane.f32.xlu0 %v2200_v14  ;;  %v143_v14 = vand.u32 4294901760, %v142_v27  ;;  %v362_v27 = vand.u32 4294901760, %v361_v52  ;;  %v2398_v52 = vld [vmem:[#allocation2 + $0xe8] sm:$0xff] }
  0x41   :  { %v2382_v50 = vand.u32 4294901760, %v2374_v24 }
  0x42   :  { %144 = vmatpush.msra.mxu1 %v143_v14  ;;  %363 = vmatpush.msra.mxu3 %v362_v27  ;;  %v3110_v14 = vand.u32 4294901760, %v2313_v51  ;;  %v373_v51 = vsub.f32 %v371_v63, %v372_v44 }
  0x43   :  { %v95_v19 = vsub.f32 %v2374_v24, %v2382_v50 }
  0x44   :  { %150 = vmatpush.msra.mxu1 %v149_v56  ;;  %v384_v56 = vand.u32 4294901760, %v383_v5  ;;  %v374_v47 = vand.u32 4294901760, %v373_v51 }
  0x45   :  { %v2390_v53 = vand.u32 4294901760, %v95_v19 }
  0x46   :  { %156 = vmatpush.msra.mxu1 %v155_v57  ;;  %v385_v19 = vsub.f32 %v383_v5, %v384_v56 }
  0x47   :  { %1051 = vmax.xlane.f32.xlu1 %v2195_v12  ;;  %1067 = vmax.xlane.f32.xlu2 %v2214_v21  ;;  %v54_v12 = vld [vmem:[#allocation2 + $0xb8] sm:$0xff]  ;;  %v3105_v21 = vand.u32 4294901760, %v2271_v38  ;;  %v365_v38 = vsub.f32 %v2206_v17, %v2249_v33  ;;  %v377_v17 = vsub.f32 %v2173_v4, %v2267_v37  ;;  %v389_v4 = vsub.f32 %v2162_v0, %v2296_v46 }
  0x48   :  { %1093 = vmax.xlane.f32.xlu0 %v2384_v45  ;;  %97 = vmatmul.f32.vlgmr.msra.gmra.mxu0 %v2390_v53  ;;  %v386_v27 = vand.u32 4294901760, %v385_v19 }
  0x49   :  { %242 = vmatpush.msra.mxu0 %v3104_v58  ;;  %209 = vmatpush.msrb.mxu1 %v2198_v13  ;;  %v366_v39 = vand.u32 4294901760, %v365_v38  ;;  %v378_v7 = vand.u32 4294901760, %v377_v17 }
  0x4a   :  { %334 = vmatmul.f32.vlgmr.msra.gmra.mxu2 %v2390_v53  ;;  %158 = vmatmul.f32.vlgmr.msra.gmra.mxu1 %v2364_v62 }
  0x4b   :  { %246 = vmatpush.msra.mxu0 %v3105_v21  ;;  %211 = vmatpush.msrb.mxu1 %v2203_v15  ;;  %v367_v11 = vsub.f32 %v365_v38, %v366_v39  ;;  %v2532_v21 = vand.u32 4294901760, %v2180_v6 }
  0x4c   :  { %491 = vmatpush.msrb.mxu2 %v366_v39  ;;  %v2568_v39 = vand.u32 4294901760, %v2384_v45 }
  0x4d   :  { %250 = vmatpush.msra.mxu0 %v3106_v16  ;;  %213 = vmatpush.msrb.mxu1 %v2211_v20  ;;  %v368_v3 = vand.u32 4294901760, %v367_v11  ;;  %v2541_v16 = vand.u32 4294901760, %v2182_v8  ;;  %v2580_v11 = vand.u32 4294901760, %v2398_v52 }
  0x4e   :  { %495 = vmatpush.msrb.mxu2 %v372_v44 }
  0x4f   :  { %1095 = vmax.xlane.f32.xlu1 %v2398_v52  ;;  %1083 = vmax.xlane.f32.xlu2 %v54_v12 }
  0x50   :  { %1081 = vmax.xlane.f32.xlu0 %v2403_v54  ;;  %254 = vmatpush.msra.mxu0 %v3107_v36 }
  0x51   :  { %215 = vmatpush.msrb.mxu1 %v2216_v22  ;;  %196 = vmatmul.f32.vlgmr.msrb.gmra.mxu0 %v2374_v24 }
  0x52   :  { %258 = vmatpush.msra.mxu0 %v3108_v41  ;;  %369 = vmatpush.msra.mxu3 %v368_v3 }
  0x53   :  { %217 = vmatpush.msrb.mxu1 %v2225_v25  ;;  %499 = vmatpush.msrb.mxu2 %v378_v7 }
  0x54   :  { %262 = vmatpush.msra.mxu0 %v3109_v40  ;;  %375 = vmatpush.msra.mxu3 %v374_v47 }
  0x55   :  { %219 = vmatpush.msrb.mxu1 %v2233_v28  ;;  %503 = vmatpush.msrb.mxu2 %v384_v56  ;;  %v2596_v56 = vsub.f32 %v2180_v6, %v2532_v21 }
  0x56   :  { %266 = vmatpush.msra.mxu0 %v3110_v14 }
  0x57   :  { %1099 = vmax.xlane.f32.xlu1 %v2419_v61  ;;  %221 = vmatpush.msrb.mxu1 %v2244_v32 }
  0x58   :  { %1097 = vmax.xlane.f32.xlu0 %v2424_v1  ;;  %270 = vmatpush.msra.mxu0 %v153_v49  ;;  %v379_v49 = vsub.f32 %v377_v17, %v378_v7 }
  0x59   :  { %223 = vmatpush.msrb.mxu1 %v2253_v34  ;;  %272 = vmatmul.f32.vlgmr.msra.gmra.mxu0 %v2364_v62 }
  0x5a   :  { %409 = vmatpush.msrb.mxu0 %v2333_v60  ;;  %227 = vmatmul.f32.vlgmr.msrb.gmra.mxu1 %v2382_v50  ;;  %v2448_v60 = vand.u32 4294901760, %v54_v12  ;;  %v380_v0 = vand.u32 4294901760, %v379_v49  ;;  %v2601_v49 = vand.u32 4294901760, %v2286_v43 }
  0x5b   :  { %285 = vmatpush.msra.mxu1 %v2198_v13  ;;  %v390_v13 = vand.u32 4294901760, %v389_v4 }
  0x5c   :  { %412 = vmatpush.msrb.mxu0 %v2329_v59  ;;  %381 = vmatpush.msra.mxu3 %v380_v0  ;;  %v2454_v59 = vsub.f32 %v54_v12, %v2448_v60  ;;  %v2609_v0 = vsub.f32 %v2182_v8, %v2541_v16  ;;  %v2627_v8 = vsub.f32 %v2398_v52, %v2580_v11 }
  0x5d   :  { %287 = vmatpush.msra.mxu1 %v2203_v15  ;;  %v391_v15 = vsub.f32 %v389_v4, %v390_v13  ;;  %507 = vmatpush.msrb.mxu2 %v390_v13  ;;  %v2617_v13 = vsub.f32 %v2384_v45, %v2568_v39 }
  0x5e   :  { %415 = vmatpush.msrb.mxu0 %v2320_v55  ;;  %387 = vmatpush.msra.mxu3 %v386_v27 }
  0x5f   :  { %289 = vmatpush.msra.mxu1 %v2211_v20  ;;  %v392_v55 = vand.u32 4294901760, %v391_v15  ;;  %646 = vmatpush.msra.mxu2 %v2454_v59  ;;  %v2472_v20 = vand.u32 4294901760, %v2403_v54  ;;  %v621_v15 = vand.u32 4294901760, %v2596_v56 }
  0x60   :  { %418 = vmatpush.msrb.mxu0 %v365_v38  ;;  %509 = vmatmul.f32.vlgmr.msrb.gmra.mxu2 %v2364_v62  ;;  %v3102_v38 = vlaneseq }
  0x61   :  { %291 = vmatpush.msra.mxu1 %v2216_v22  ;;  %393 = vmatpush.msra.mxu3 %v392_v55  ;;  %v2478_v22 = vand.u32 4294901760, %v2346_v2  ;;  %v3103_v55 = vand.u32 4294901760, %v2609_v0 }
  0x62   :  { %421 = vmatpush.msrb.mxu0 %v371_v63  ;;  %395 = vmatmul.f32.vlgmr.msra.gmra.mxu3 %v2364_v62  ;;  %v2604_v19 = vand.u32 127, %v3102_v38 }
  0x63   :  { %293 = vmatpush.msra.mxu1 %v2225_v25  ;;  %522 = vmatpush.msrb.mxu3 %v2220_v23  ;;  %v2485_v25 = vand.u32 4294901760, %v2284_v42 }
  0x64   :  { %424 = vmatpush.msrb.mxu0 %v377_v17  ;;  %v2562_v17 = vand.u32 4294901760, %v2188_v10  ;;  %v2633_v45 = vadd.s32 4294967288, %v2604_v19 }
  0x65   :  { %295 = vmatpush.msra.mxu1 %v2233_v28  ;;  %524 = vmatpush.msrb.mxu3 %v2228_v26  ;;  %v2493_v28 = vand.u32 4294901760, %v2241_v31  ;;  %v2522_v58 = vsub.f32 %v2284_v42, %v2485_v25 }
  0x66   :  { %427 = vmatpush.msrb.mxu0 %v383_v5 }
  0x67   :  { %297 = vmatpush.msra.mxu1 %v2244_v32  ;;  %526 = vmatpush.msrb.mxu3 %v2237_v30  ;;  %v2503_v32 = vsub.f32 %v2346_v2, %v2478_v22 }
  0x68   :  { %430 = vmatpush.msrb.mxu0 %v389_v4 }
  0x69   :  { %299 = vmatpush.msra.mxu1 %v2253_v34  ;;  %528 = vmatpush.msrb.mxu3 %v2249_v33  ;;  %v2508_v34 = vand.u32 4294901760, %v2186_v9  ;;  %v597_v12 = vand.u32 4294901760, %v2503_v32 }
  0x6a   :  { %301 = vmatmul.f32.vlgmr.msra.gmra.mxu1 %v2364_v62  ;;  %551 = vmatpush.msra.mxu0 %v2448_v60 }
  0x6b   :  { %446 = vmatpush.msrb.mxu1 %v2220_v23  ;;  %530 = vmatpush.msrb.mxu3 %v2258_v35  ;;  %v585_v23 = vand.u32 4294901760, %v2454_v59  ;;  %v598_v42 = vsub.f32 %v2503_v32, %v597_v12  ;;  %v2558_v40 = vsub.f32 %v2186_v9, %v2508_v34  ;;  %v2577_v9 = vand.u32 4294901760, %v2208_v18 }
  0x6c   :  { %553 = vmatpush.msra.mxu0 %v2472_v20 }
  0x6d   :  { %448 = vmatpush.msrb.mxu1 %v2228_v26  ;;  %532 = vmatpush.msrb.mxu3 %v2267_v37  ;;  %v2489_v26 = vsub.f32 %v2403_v54, %v2472_v20  ;;  %v599_v41 = vand.u32 4294901760, %v598_v42  ;;  %v615_v47 = vand.u32 4294901760, %v2558_v40  ;;  %v628_v42 = vsub.f32 %v2609_v0, %v3103_v55 }
  0x6e   :  { %555 = vmatpush.msra.mxu0 %v2478_v22 }
  0x6f   :  { %450 = vmatpush.msrb.mxu1 %v2237_v30  ;;  %534 = vmatpush.msrb.mxu3 %v2303_v48  ;;  %v586_v30 = vsub.f32 %v2454_v59, %v585_v23  ;;  %v616_v27 = vsub.f32 %v2558_v40, %v615_v47  ;;  %v629_v55 = vand.u32 4294901760, %v628_v42 }
  0x70   :  { %649 = vmatpush.msra.mxu2 %v2489_v26  ;;  %557 = vmatpush.msra.mxu0 %v2485_v25 }
  0x71   :  { %452 = vmatpush.msrb.mxu1 %v2249_v33  ;;  %v591_v33 = vand.u32 4294901760, %v2489_v26  ;;  %536 = vmatpush.msrb.mxu3 %v2296_v46  ;;  %v587_v57 = vand.u32 4294901760, %v586_v30  ;;  %v617_v30 = vand.u32 4294901760, %v616_v27 }
  0x72   :  { %652 = vmatpush.msra.mxu2 %v2503_v32  ;;  %559 = vmatpush.msra.mxu0 %v2493_v28 }
  0x73   :  { %454 = vmatpush.msrb.mxu1 %v2258_v35  ;;  %v2511_v35 = vand.u32 4294901760, %v2419_v61  ;;  %683 = vmatpush.msra.mxu3 %v2448_v60  ;;  %v592_v2 = vsub.f32 %v2489_v26, %v591_v33 }
  0x74   :  { %655 = vmatpush.msra.mxu2 %v2522_v58  ;;  %561 = vmatpush.msra.mxu0 %v2508_v34 }
  0x75   :  { %456 = vmatpush.msrb.mxu1 %v2267_v37  ;;  %v2528_v37 = vsub.f32 %v2241_v31, %v2493_v28  ;;  %685 = vmatpush.msra.mxu3 %v2472_v20  ;;  %v593_v54 = vand.u32 4294901760, %v592_v2  ;;  %v2544_v31 = vand.u32 4294901760, %v2424_v1  ;;  %v2548_v36 = vsub.f32 %v2419_v61, %v2511_v35 }
  0x76   :  { %563 = vmatpush.msra.mxu0 %v2532_v21  ;;  %538 = vmatmul.f32.vlgmr.msrb.gmra.mxu3 %v2364_v62 }
  0x77   :  { %458 = vmatpush.msrb.mxu1 %v2303_v48  ;;  %v603_v48 = vand.u32 4294901760, %v2522_v58  ;;  %687 = vmatpush.msra.mxu3 %v2478_v22  ;;  %v609_v61 = vand.u32 4294901760, %v2528_v37  ;;  %v2590_v51 = vsub.f32 %v2424_v1, %v2544_v31  ;;  %v822_v7 = vand.u32 4294901760, %v2548_v36 }
  0x78   :  { %658 = vmatpush.msra.mxu2 %v2528_v37  ;;  %565 = vmatpush.msra.mxu0 %v2541_v16 }
  0x79   :  { %460 = vmatpush.msrb.mxu1 %v2296_v46  ;;  %v604_v63 = vsub.f32 %v2522_v58, %v603_v48  ;;  %v2565_v46 = vand.u32 4294901760, %v2235_v29  ;;  %689 = vmatpush.msra.mxu3 %v2485_v25  ;;  %v610_v3 = vsub.f32 %v2528_v37, %v609_v61  ;;  %v823_v52 = vsub.f32 %v2548_v36, %v822_v7 }
  0x7a   :  { %v2570_v14 = vpop.xlane.xlu1 %1053  ;;  %v2572_v5 = vpop.xlane.xlu2 %1041  ;;  %661 = vmatpush.msra.mxu2 %v2558_v40  ;;  %433 = vmatmul.f32.vlgmr.msrb.gmra.mxu0 %v2374_v24  ;;  %v828_v2 = vand.u32 4294901760, %v2590_v51 }
  0x7b   :  { %588 = vmatpush.msra.mxu1 %v587_v57  ;;  %v2582_v44 = vpop.xlane.xlu0 %1037  ;;  %v605_v4 = vand.u32 4294901760, %v604_v63  ;;  %691 = vmatpush.msra.mxu3 %v2493_v28  ;;  %v611_v1 = vand.u32 4294901760, %v610_v3  ;;  %v2613_v6 = vsub.f32 %v2235_v29, %v2565_v46  ;;  %v2630_v29 = vadd.s32 4294967280, %v2604_v19 }
  0x7c   :  { %664 = vmatpush.msra.mxu2 %v2596_v56  ;;  %v622_v57 = vsub.f32 %v2596_v56, %v621_v15  ;;  %716 = vmatpush.msrb.mxu0 %v585_v23  ;;  %v1136_v59 = vperm.slane %v2582_v44, %v2604_v19  ;;  %v2684_v44 = vsub.f32 %v2208_v18, %v2577_v9 }
  0x7d   :  { %594 = vmatpush.msra.mxu1 %v593_v54  ;;  %693 = vmatpush.msra.mxu3 %v2508_v34  ;;  %v2648_v54 = vsub.f32 %v2286_v43, %v2601_v49  ;;  %v824_v43 = vand.u32 4294901760, %v823_v52  ;;  %v1142_v27 = vperm.slane %v2572_v5, %v2630_v29  ;;  %v840_v5 = vand.u32 4294901760, %v2617_v13 }
  0x7e   :  { %667 = vmatpush.msra.mxu2 %v2609_v0  ;;  %v623_v3 = vand.u32 4294901760, %v622_v57  ;;  %v834_v57 = vand.u32 4294901760, %v2627_v8  ;;  %720 = vmatpush.msrb.mxu0 %v591_v33  ;;  %v2698_v18 = vsub.f32 %v2188_v10, %v2562_v17  ;;  %v858_v32 = vand.u32 4294901760, %v2684_v44 }
  0x7f   :  { %600 = vmatpush.msra.mxu1 %v599_v41  ;;  %695 = vmatpush.msra.mxu3 %v2532_v21  ;;  %v1165_v41 = vperm.slane %v2570_v14, %v2604_v19  ;;  %v846_v26 = vand.u32 4294901760, %v2648_v54 }
  0x80   :  { %788 = vmatpush.msrb.mxu2 %v2511_v35  ;;  %464 = vmatmul.f32.vlgmr.msrb.gmra.mxu1 %v2382_v50  ;;  %v859_v58 = vsub.f32 %v2684_v44, %v858_v32 }
  0x81   :  { %606 = vmatpush.msra.mxu1 %v605_v4  ;;  %697 = vmatpush.msra.mxu3 %v2541_v16 }
  0x82   :  { %v1056_v63 = vpop.xlane.xlu1 %1055  ;;  %v2656_v4 = vpop.xlane.xlu2 %1057  ;;  %790 = vmatpush.msrb.mxu2 %v2544_v31  ;;  %724 = vmatpush.msrb.mxu0 %v597_v12 }
  0x83   :  { %612 = vmatpush.msra.mxu1 %v611_v1  ;;  %v829_v1 = vsub.f32 %v2590_v51, %v828_v2  ;;  %v1166_v38 = vperm.slane %v1056_v63, %v2633_v45  ;;  %v1040_v14 = vpop.xlane.xlu0 %1039  ;;  %825 = vmatpush.msrb.mxu3 %v824_v43  ;;  %v847_v43 = vsub.f32 %v2648_v54, %v846_v26 }
  0x84   :  { %v1138_v23 = vperm.slane %v1040_v14, %v2633_v45  ;;  %792 = vmatpush.msrb.mxu2 %v2580_v11  ;;  %728 = vmatpush.msrb.mxu0 %v603_v48  ;;  %v864_v48 = vand.u32 4294901760, %v2698_v18  ;;  %v860_v14 = vand.u32 4294901760, %v859_v58 }
  0x85   :  { %618 = vmatpush.msra.mxu1 %v617_v30  ;;  %v830_v52 = vand.u32 4294901760, %v829_v1  ;;  %v2675_v63 = vsel %vm1139_vm1, %v1166_v38, %v1165_v41  ;;  %v835_v30 = vsub.f32 %v2627_v8, %v834_v57  ;;  %v841_v38 = vsub.f32 %v2617_v13, %v840_v5  ;;  %670 = vmatmul.f32.vlgmr.msra.gmra.mxu2 %v2374_v24 }
  0x86   :  { %v1140_v42 = vsel %vm1139_vm1, %v1138_v23, %v1136_v59  ;;  %v852_v1 = vand.u32 4294901760, %v2613_v6  ;;  %794 = vmatpush.msrb.mxu2 %v2568_v39  ;;  %v848_v10 = vand.u32 4294901760, %v847_v43  ;;  %732 = vmatpush.msrb.mxu0 %v609_v61  ;;  %v865_v59 = vsub.f32 %v2698_v18, %v864_v48 }
  0x87   :  { %624 = vmatpush.msra.mxu1 %v623_v3  ;;  %v2694_v33 = vsel %vm1143_vm2, %v1142_v27, %v1140_v42  ;;  %831 = vmatpush.msrb.mxu3 %v830_v52  ;;  %v836_v41 = vand.u32 4294901760, %v835_v30  ;;  %v842_v3 = vand.u32 4294901760, %v841_v38  ;;  %v2842_v23 = vadd.s32 4294967240, %v2604_v19 }
  0x88   :  { %796 = vmatpush.msrb.mxu2 %v2601_v49  ;;  %736 = vmatpush.msrb.mxu0 %v615_v47 }
  0x89   :  { %630 = vmatpush.msra.mxu1 %v629_v55  ;;  %837 = vmatpush.msrb.mxu3 %v836_v41 }
  0x8a   :  { %v2708_v55 = vpop.xlane.xlu1 %1071  ;;  %v2710_v27 = vpop.xlane.xlu2 %1043  ;;  %798 = vmatpush.msrb.mxu2 %v2565_v46  ;;  %740 = vmatpush.msrb.mxu0 %v621_v15 }
  0x8b   :  { %759 = vmatpush.msrb.mxu1 %v2448_v60  ;;  %v853_v60 = vsub.f32 %v2613_v6, %v852_v1  ;;  %v2719_v12 = vpop.xlane.xlu0 %1069  ;;  %843 = vmatpush.msrb.mxu3 %v842_v3  ;;  %v1181_v58 = vperm.slane %v2708_v55, %v2633_v45 }
  0x8c   :  { %800 = vmatpush.msrb.mxu2 %v2577_v9  ;;  %571 = vmatmul.f32.vlgmr.msra.gmra.mxu0 %v2390_v53 }
  0x8d   :  { %761 = vmatpush.msrb.mxu1 %v2472_v20  ;;  %v854_v20 = vand.u32 4294901760, %v853_v60  ;;  %849 = vmatpush.msrb.mxu3 %v848_v10 }
  0x8e   :  { %802 = vmatpush.msrb.mxu2 %v2562_v17  ;;  %701 = vmatmul.f32.vlgmr.msra.gmra.mxu3 %v2382_v50 }
  0x8f   :  { %763 = vmatpush.msrb.mxu1 %v2478_v22  ;;  %855 = vmatpush.msrb.mxu3 %v854_v20  ;;  %v866_v22 = vand.u32 4294901760, %v865_v59 }
  0x90   :  { %953 = vmatpush.msra.mxu2 %v822_v7  ;;  %632 = vmatmul.f32.vlgmr.msra.gmra.mxu1 %v2364_v62 }
  0x91   :  { %765 = vmatpush.msrb.mxu1 %v2485_v25  ;;  %861 = vmatpush.msrb.mxu3 %v860_v14 }
  0x92   :  { %v2738_v25 = vpop.xlane.xlu1 %1073  ;;  %v2740_v37 = vpop.xlane.xlu2 %1085  ;;  %957 = vmatpush.msra.mxu2 %v828_v2 }
  0x93   :  { %767 = vmatpush.msrb.mxu1 %v2493_v28  ;;  %v2743_v40 = vpop.xlane.xlu0 %1059  ;;  %v3111_v28 = vand.u32 4294901760, %v2609_v0  ;;  %867 = vmatpush.msrb.mxu3 %v866_v22  ;;  %v1183_v14 = vperm.slane %v2738_v25, %v2630_v29 }
  0x94   :  { %961 = vmatpush.msra.mxu2 %v834_v57 }
  0x95   :  { %769 = vmatpush.msrb.mxu1 %v2508_v34  ;;  %744 = vmatpush.msrb.mxu0 %v3111_v28 }
  0x96   :  { %996 = vmatpush.msra.mxu3 %v2511_v35  ;;  %965 = vmatpush.msra.mxu2 %v840_v5 }
  0x97   :  { %771 = vmatpush.msrb.mxu1 %v2532_v21  ;;  %883 = vmatpush.msra.mxu0 %v2548_v36 }
  0x98   :  { %998 = vmatpush.msra.mxu3 %v2544_v31  ;;  %808 = vmatmul.f32.vlgmr.msrb.gmra.mxu2 %v2390_v53 }
  0x99   :  { %773 = vmatpush.msrb.mxu1 %v2541_v16  ;;  %886 = vmatpush.msra.mxu0 %v2590_v51 }
  0x9a   :  { %v2762_v34 = vpop.xlane.xlu1 %1045  ;;  %v2764_v21 = vpop.xlane.xlu2 %1061  ;;  %1000 = vmatpush.msra.mxu3 %v2580_v11  ;;  %969 = vmatpush.msra.mxu2 %v846_v26 }
  0x9b   :  { %920 = vmatpush.msra.mxu1 %v2511_v35  ;;  %v2769_v36 = vpop.xlane.xlu0 %1087  ;;  %889 = vmatpush.msra.mxu0 %v2627_v8 }
  0x9c   :  { %1002 = vmatpush.msra.mxu3 %v2568_v39  ;;  %746 = vmatmul.f32.vlgmr.msrb.gmra.mxu0 %v2364_v62  ;;  %v1196_v25 = vperm.slane %v2769_v36, %v2633_v45 }
  0x9d   :  { %922 = vmatpush.msra.mxu1 %v2544_v31  ;;  %892 = vmatpush.msra.mxu0 %v2617_v13  ;;  %v1101_v31 = vld [vmem:[%s3092_s1] sm:$0xf]  ;;  %v2828_v13 = vadd.s32 4294967248, %v2604_v19 }
  0x9e   :  { %869 = vmatmul.f32.vlgmr.msrb.gmra.mxu3 %v2364_v62  ;;  %973 = vmatpush.msra.mxu2 %v852_v1  ;;  %v1219_v61 = vsel %vm64_vm0, %v1101_v31, 0 }
  0x9f   :  { %924 = vmatpush.msra.mxu1 %v2580_v11  ;;  %1004 = vmatpush.msra.mxu3 %v2601_v49 }
  0xa0   :  { %895 = vmatpush.msra.mxu0 %v2648_v54  ;;  %775 = vmatmul.f32.vlgmr.msrb.gmra.mxu1 %v2364_v62 }
  0xa1   :  { %926 = vmatpush.msra.mxu1 %v2568_v39  ;;  %977 = vmatpush.msra.mxu2 %v858_v32  ;;  %v1236_v39 = vand.u32 4294901760, %v1219_v61 }
  0xa2   :  { %v2787_v53 = vpop.xlane.xlu1 %1089  ;;  %v2789_v35 = vpop.xlane.xlu2 %1047  ;;  %898 = vmatpush.msra.mxu0 %v2613_v6  ;;  %1006 = vmatpush.msra.mxu3 %v2565_v46  ;;  %v1168_v6 = vperm.slane %v2656_v4, %v2630_v29 }
  0xa3   :  { %v2792_v16 = vpop.xlane.xlu0 %1075  ;;  %928 = vmatpush.msra.mxu1 %v2601_v49  ;;  %981 = vmatpush.msra.mxu2 %v864_v48  ;;  %v1180_v48 = vperm.slane %v2719_v12, %v2604_v19  ;;  %v1195_v12 = vperm.slane %v2740_v37, %v2604_v19  ;;  %v1198_v31 = vperm.slane %v2787_v53, %v2630_v29 }
  0xa4   :  { %901 = vmatpush.msra.mxu0 %v2684_v44  ;;  %1008 = vmatpush.msra.mxu3 %v2577_v9  ;;  %v1169_v52 = vsel %vm1143_vm2, %v1168_v6, %v2675_v63 }
  0xa5   :  { %930 = vmatpush.msra.mxu1 %v2565_v46  ;;  %983 = vmatmul.f32.vlgmr.msra.gmra.mxu2 %v2364_v62  ;;  %v1263_v46 = vsub.f32 %v1219_v61, %v1236_v39  ;;  %v1197_v45 = vsel %vm1139_vm1, %v1196_v25, %v1195_v12 }
  0xa6   :  { %904 = vmatpush.msra.mxu0 %v2698_v18  ;;  %1010 = vmatpush.msra.mxu3 %v2562_v17  ;;  %v1199_v29 = vsel %vm1143_vm2, %v1198_v31, %v1197_v45 }
  0xa7   :  { %932 = vmatpush.msra.mxu1 %v2577_v9  ;;  %907 = vmatmul.f32.vlgmr.msra.gmra.mxu0 %v2374_v24  ;;  %v1264_v56 = vand.u32 4294901760, %v1263_v46  ;;  %v2817_v24 = vadd.s32 4294967272, %v2604_v19 }
  0xa8   :  { %1012 = vmatmul.f32.vlgmr.msra.gmra.mxu3 %v2364_v62  ;;  %1237 = vmatpush.xpose.msrb.mxu0 %v1236_v39  ;;  %v2820_v62 = vadd.s32 4294967264, %v2604_v19 }
  0xa9   :  { %934 = vmatpush.msra.mxu1 %v2562_v17  ;;  %1290 = vmatpush.xpose.msrb.mxu2 %v1263_v46  ;;  %v1265_v9 = vsub.f32 %v1263_v46, %v1264_v56  ;;  %v1146_v15 = vperm.slane %v2710_v27, %v2817_v24  ;;  %v1170_v8 = vperm.slane %v2743_v40, %v2817_v24 }
  0xaa   :  { %v2811_v11 = vpop.xlane.xlu1 %1077  ;;  %v2813_v51 = vpop.xlane.xlu2 %1091  ;;  %938 = vmatmul.f32.vlgmr.msra.gmra.mxu1 %v2382_v50  ;;  %1313 = vmatpush.xpose.msrb.mxu3 %v1236_v39  ;;  %v2823_v50 = vadd.s32 4294967256, %v2604_v19  ;;  %v1150_v2 = vperm.slane %v2762_v34, %v2820_v62  ;;  %v1172_v54 = vperm.slane %v2764_v21, %v2820_v62  ;;  %v1185_v59 = vperm.slane %v2792_v16, %v2817_v24 }
  0xab   :  { %v1064_v7 = vpop.xlane.xlu0 %1063  ;;  %v1266_v47 = vand.u32 4294901760, %v1265_v9  ;;  %v1148_v44 = vsel %vm1147_vm3, %v1146_v15, %v2694_v33  ;;  %v1171_v42 = vsel %vm1147_vm3, %v1170_v8, %v1169_v52  ;;  %v1187_v40 = vperm.slane %v2811_v11, %v2820_v62 }
  0xac   :  { %1339 = vmatpush.xpose.msra.mxu0 %v1264_v56  ;;  %v1154_v4 = vperm.slane %v2789_v35, %v2823_v50  ;;  %v1174_v57 = vperm.slane %v1064_v7, %v2823_v50  ;;  %v1152_v38 = vsel %vm1151_vm4, %v1150_v2, %v1148_v44  ;;  %v1173_v26 = vsel %vm1151_vm4, %v1172_v54, %v1171_v42 }
  0xad   :  { %1267 = vmatpush.xpose.msrb.mxu1 %v1266_v47  ;;  %v1182_v34 = vsel %vm1139_vm1, %v1181_v58, %v1180_v48  ;;  %v1200_v46 = vperm.slane %v2813_v51, %v2817_v24 }
  0xae   :  { %v1156_v63 = vsel %vm1155_vm5, %v1154_v4, %v1152_v38  ;;  %v1175_v3 = vsel %vm1155_vm5, %v1174_v57, %v1173_v26  ;;  %v1184_v55 = vsel %vm1143_vm2, %v1183_v14, %v1182_v34 }
  0xaf   :  { %v1186_v61 = vsel %vm1147_vm3, %v1185_v59, %v1184_v55  ;;  %v1201_v9 = vsel %vm1147_vm3, %v1200_v46, %v1199_v29 }
  0xb1   :  { %1361 = vmatpush.xpose.msra.mxu1 %v1236_v39  ;;  %v1188_v39 = vsel %vm1151_vm4, %v1187_v40, %v1186_v61 }
  0xb2   :  { %v1066_v17 = vpop.xlane.xlu1 %1065  ;;  %v1080_v49 = vpop.xlane.xlu2 %1079 }
  0xb3   :  { %v1050_v0 = vpop.xlane.xlu0 %1049  ;;  %v1176_v5 = vperm.slane %v1066_v17, %v2828_v13  ;;  %v1189_v21 = vperm.slane %v1080_v49, %v2823_v50 }
  0xb4   :  { %v1158_v30 = vperm.slane %v1050_v0, %v2828_v13 }
  0xb5   :  { %v1177_v27 = vsel %vm1159_vm6, %v1176_v5, %v1175_v3  ;;  %v1190_v11 = vsel %vm1155_vm5, %v1189_v21, %v1188_v39 }
  0xb6   :  { %v1160_v10 = vsel %vm1159_vm6, %v1158_v30, %v1156_v63 }
  0xba   :  { %v1052_v41 = vpop.xlane.xlu1 %1051  ;;  %v1068_v18 = vpop.xlane.xlu2 %1067 }
  0xbb   :  { %v1162_v43 = vperm.slane %v1052_v41, %v2842_v23  ;;  %v1178_v1 = vperm.slane %v1068_v18, %v2842_v23  ;;  %v1094_v33 = vpop.xlane.xlu0 %1093 }
  0xbc   :  { %v1202_v37 = vperm.slane %v1094_v33, %v2820_v62 }
  0xbd   :  { %v1164_v60 = vsel %vm1163_vm7, %v1162_v43, %v1160_v10  ;;  %v1179_v32 = vsel %vm1163_vm7, %v1178_v1, %v1177_v27 }
  0xbe   :  { %v1211_v20 = vsel %vm1210_vm8, %v1179_v32, %v1164_v60  ;;  %v1203_v24 = vsel %vm1151_vm4, %v1202_v37, %v1201_v9 }
  0xc2   :  { %v1096_v22 = vpop.xlane.xlu1 %1095  ;;  %v1084_v16 = vpop.xlane.xlu2 %1083 }
  0xc3   :  { %v1082_v28 = vpop.xlane.xlu0 %1081  ;;  %v1193_v7 = vperm.slane %v1084_v16, %v2842_v23  ;;  %v1204_v36 = vperm.slane %v1096_v22, %v2823_v50 }
  0xc4   :  { %v1191_v35 = vperm.slane %v1082_v28, %v2828_v13 }
  0xc5   :  { %v1205_v49 = vsel %vm1155_vm5, %v1204_v36, %v1203_v24  ;;  %v98_v0 = vpop.f32.mrf.mxu0 }
  0xc6   :  { %v1192_v56 = vsel %vm1159_vm6, %v1191_v35, %v1190_v11 }
  0xc7   :  { %v1194_v62 = vsel %vm1163_vm7, %v1193_v7, %v1192_v56  ;;  %v159_v57 = vpop.f32.mrf.mxu1 }
  0xc8   :  { %v1213_v6 = vsel %vm1212_vm9, %v1194_v62, %v1211_v20  ;;  %v160_v5 = vadd.f32 %v159_v57, %v98_v0 }
  0xca   :  { %v1100_v53 = vpop.xlane.xlu1 %1099 }
  0xcb   :  { %v1098_v47 = vpop.xlane.xlu0 %1097  ;;  %v1208_v51 = vperm.slane %v1100_v53, %v2842_v23 }
  0xcc   :  { %v1206_v17 = vperm.slane %v1098_v47, %v2828_v13 }
  0xcd   :  { %v335_v43 = vpop.f32.mrf.mxu2 }
  0xce   :  { %v1207_v50 = vsel %vm1159_vm6, %v1206_v17, %v1205_v49  ;;  %v197_v52 = vpop.f32.mrf.mxu0 }
  0xcf   :  { %v1209_v15 = vsel %vm1163_vm7, %v1208_v51, %v1207_v50  ;;  %v198_v44 = vadd.f32 %v197_v52, %v160_v5  ;;  %v3112_v51 = vlaneseq }
  0xd0   :  { %v1215_v8 = vsel %vm1214_vm10, %v1209_v15, %v1213_v6 }
  0xd1   :  { %v1216_v2 = vsel %vm64_vm0, %v1215_v8, 0  ;;  %v2909_v24 = vshrl.u32 %v3112_v51, 7 }
  0xd2   :  { %v1238_v54 = vand.u32 4294901760, %v1216_v2 }
  0xd3   :  { %2038 = vset.pattern.permute.xlu2 %v2909_v24  ;;  %2037 = vset.pattern.permute.xlu1 %v2909_v24 }
  0xd4   :  { %1269 = vmatmul.f32.vlgmr.msrb.gmra.mxu1 %v1238_v54  ;;  %v1239_v4 = vsub.f32 %v1216_v2, %v1238_v54  ;;  %2036 = vset.pattern.permute.xlu0 %v2909_v24 }
  0xd6   :  { %1293 = vmatmul.f32.vlgmr.msrb.gmra.mxu2 %v1239_v4  ;;  %v1240_v13 = vand.u32 4294901760, %v1239_v4  ;;  %v273_v26 = vpop.f32.mrf.mxu0 }
  0xd7   :  { %v228_v42 = vpop.f32.mrf.mxu1 }
  0xd8   :  { %1317 = vmatmul.f32.vlgmr.msrb.gmra.mxu3 %v1240_v13  ;;  %v1241_v23 = vsub.f32 %v1239_v4, %v1240_v13  ;;  %v229_v38 = vadd.f32 %v228_v42, %v198_v44 }
  0xda   :  { %v1242_v30 = vand.u32 4294901760, %v1241_v23  ;;  %v274_v41 = vadd.f32 %v273_v26, %v229_v38 }
  0xdc   :  { %1243 = vmatmul.f32.vlgmr.msrb.gmra.mxu0 %v1242_v30  ;;  %1363 = vmatmul.f32.vlgmr.msra.gmra.mxu1 %v1238_v54  ;;  %v2134_v30 = vmov 0  }
  0xe3   :  { %v510_v20 = vpop.f32.mrf.mxu2 }
  0xe4   :  { %1341 = vmatmul.f32.vlgmr.msra.gmra.mxu0 %v1238_v54 }
  0xe5   :  { %v396_v1 = vpop.f32.mrf.mxu3 }
  0xe6   :  { %v397_v33 = vadd.f32 %v396_v1, %v335_v43 }
  0xe7   :  { %v302_v18 = vpop.f32.mrf.mxu1 }
  0xe8   :  { %v303_v63 = vadd.f32 %v302_v18, %v274_v41  ;;  %v1375_v41 = vld [vmem:[%s3093_s2 + $0x38] sm:$0xff]  ;;  %v1374_v18 = vld [vmem:[%s3093_s2 + $0x30] sm:$0xff] }
  0xe9   :  { %v1458_v43 = vsel %vm1436_vm12, %v1374_v18, 0 }
  0xea   :  { %v1017_v3 = vsel %vm1016_vm11, %v303_v63, 0.0  ;;  %v1373_v63 = vld [vmem:[%s3093_s2 + $0x28] sm:$0xff] }
  0xeb   :  { %1018 = vadd.xlane.f32.xlu2 %v1017_v3  ;;  %v1461_v3 = vsel %vm1436_vm12, %v1375_v41, 0  ;;  %v1455_v1 = vsel %vm1436_vm12, %v1373_v63, 0 }
  0xf7   :  { %v434_v27 = vpop.f32.mrf.mxu0 }
  0xf8   :  { %v435_v10 = vadd.f32 %v434_v27, %v397_v33  ;;  %v1372_v33 = vld [vmem:[%s3093_s2 + $0x20] sm:$0xff]  ;;  %v2931_v27 = vand.u32 4294901760, %v1461_v3 }
  0xf9   :  { %v539_v48 = vpop.f32.mrf.mxu3 }
  0xfa   :  { %1472 = vmatpush.xpose.msra.mxu2 %v2931_v27  ;;  %1604 = vmatpush.xpose.msrb.mxu1 %v2931_v27 }
  0xfd   :  { %v465_v60 = vpop.f32.mrf.mxu1 }
  0xfe   :  { %v466_v32 = vadd.f32 %v465_v60, %v435_v10  ;;  %v2933_v10 = vand.u32 4294901760, %v1458_v43  ;;  %v2935_v60 = vand.u32 4294901760, %v1455_v1 }
 0x100   :  { %v511_v58 = vadd.f32 %v510_v20, %v466_v32  ;;  %v1452_v32 = vsel %vm1436_vm12, %v1372_v33, 0  ;;  %1474 = vmatpush.xpose.msra.mxu2 %v2933_v10  ;;  %1606 = vmatpush.xpose.msrb.mxu1 %v2933_v10 }
 0x102   :  { %v540_v14 = vadd.f32 %v539_v48, %v511_v58  ;;  %v2939_v58 = vsub.f32 %v1461_v3, %v2931_v27  ;;  %v2942_v48 = vsub.f32 %v1458_v43, %v2933_v10 }
 0x104   :  { %v1020_v59 = vsel %vm1016_vm11, %v540_v14, 0.0  ;;  %v2946_v14 = vsub.f32 %v1455_v1, %v2935_v60  ;;  %1567 = vmatpush.xpose.msrb.mxu0 %v2939_v58  ;;  %1476 = vmatpush.xpose.msra.mxu2 %v2935_v60 }
 0x105   :  { %1021 = vadd.xlane.f32.xlu0 %v1020_v59  ;;  %v2949_v59 = vand.u32 4294901760, %v1452_v32  ;;  %1608 = vmatpush.xpose.msrb.mxu1 %v2935_v60 }
 0x108   :  { %v671_v34 = vpop.f32.mrf.mxu2  ;;  %1570 = vmatpush.xpose.msrb.mxu0 %v2942_v48  ;;  %1478 = vmatpush.xpose.msra.mxu2 %v2949_v59 }
 0x109   :  { %v572_v22 = vpop.f32.mrf.mxu0  ;;  %1610 = vmatpush.xpose.msrb.mxu1 %v2949_v59 }
 0x10c   :  { %1573 = vmatpush.xpose.msrb.mxu0 %v2946_v14 }
 0x10d   :  { %v633_v40 = vpop.f32.mrf.mxu1 }
 0x10e   :  { %v634_v28 = vadd.f32 %v633_v40, %v572_v22  ;;  %v1506_v40 = vand.u32 4294901760, %v2939_v58 }
 0x110   :  { %v672_v21 = vadd.f32 %v671_v34, %v634_v28  ;;  %v1512_v28 = vand.u32 4294901760, %v2942_v48 }
 0x111   :  { %v702_v55 = vpop.f32.mrf.mxu3 }
 0x112   :  { %v703_v12 = vadd.f32 %v702_v55, %v672_v21  ;;  %v1507_v21 = vsub.f32 %v2939_v58, %v1506_v40  ;;  %v1513_v55 = vsub.f32 %v2942_v48, %v1512_v28 }
 0x119   :  { %v747_v25 = vpop.f32.mrf.mxu0 }
 0x11a   :  { %v748_v35 = vadd.f32 %v747_v25, %v703_v12  ;;  %v1518_v12 = vand.u32 4294901760, %v2946_v14  ;;  %v2964_v25 = vsub.f32 %v1452_v32, %v2949_v59 }
 0x11b   :  { %v809_v31 = vpop.f32.mrf.mxu2 }
 0x11c   :  { %1576 = vmatpush.xpose.msrb.mxu0 %v2964_v25 }
 0x11d   :  { %v776_v16 = vpop.f32.mrf.mxu1 }
 0x11e   :  { %v777_v61 = vadd.f32 %v776_v16, %v748_v35  ;;  %v1508_v35 = vand.u32 4294901760, %v1507_v21  ;;  %v1514_v16 = vand.u32 4294901760, %v1513_v55 }
 0x120   :  { %v1023_v46 = vsel %vm1016_vm11, %v777_v61, 0.0  ;;  %1509 = vmatpush.xpose.msra.mxu3 %v1508_v35 }
 0x121   :  { %v870_v39 = vpop.f32.mrf.mxu3  ;;  %1024 = vadd.xlane.f32.xlu1 %v1023_v46  ;;  %v1524_v46 = vand.u32 4294901760, %v2964_v25 }
 0x122   :  { %v871_v11 = vadd.f32 %v870_v39, %v809_v31  ;;  %v1519_v31 = vsub.f32 %v2946_v14, %v1518_v12 }
 0x124   :  { %v908_v37 = vpop.f32.mrf.mxu0  ;;  %1515 = vmatpush.xpose.msra.mxu3 %v1514_v16 }
 0x125   :  { %v909_v7 = vadd.f32 %v908_v37, %v871_v11 }
 0x127   :  { %v939_v45 = vpop.f32.mrf.mxu1 }
 0x128   :  { %v940_v36 = vadd.f32 %v939_v45, %v909_v7  ;;  %v984_v56 = vpop.f32.mrf.mxu2  ;;  %v1520_v7 = vand.u32 4294901760, %v1519_v31  ;;  %v1525_v45 = vsub.f32 %v2964_v25, %v1524_v46 }
 0x12a   :  { %v985_v29 = vadd.f32 %v984_v56, %v940_v36  ;;  %1521 = vmatpush.xpose.msra.mxu3 %v1520_v7 }
 0x12b   :  { %v1013_v53 = vpop.f32.mrf.mxu3 }
 0x12c   :  { %v1014_v9 = vadd.f32 %v1013_v53, %v985_v29 }
 0x12e   :  { %v1026_v47 = vsel %vm1016_vm11, %v1014_v9, 0.0  ;;  %v1526_v9 = vand.u32 4294901760, %v1525_v45 }
 0x12f   :  { %1027 = vadd.xlane.f32.xlu2 %v1026_v47 }
 0x130   :  { %1527 = vmatpush.xpose.msra.mxu3 %v1526_v9 }
 0x151   :  { %v1270_v62 = vpop.f32.mrf.mxu1 }
 0x159   :  { %v1244_v17 = vpop.f32.mrf.mxu0  ;;  %v1294_v50 = vpop.f32.mrf.mxu2 }
 0x15a   :  { %v1271_v49 = vadd.f32 %v1270_v62, %v1244_v17  ;;  %v1364_v54 = vpop.f32.mrf.mxu1 }
 0x15b   :  { %v1318_v6 = vpop.f32.mrf.mxu3 }
 0x15c   :  { %v1295_v0 = vadd.f32 %v1294_v50, %v1271_v49  ;;  %v1371_v50 = vld [vmem:[%s3093_s2 + $0x18] sm:$0xff] }
 0x15e   :  { %v1319_v15 = vadd.f32 %v1318_v6, %v1295_v0  ;;  %v1019_v44 = vpop.xlane.xlu2 %1018  ;;  %v1449_v0 = vsel %vm1436_vm12, %v1371_v50, 0 }
 0x15f   :  { %v1029_v11 = vmul.f32 0.0078125, %v1019_v44  ;;  %v1479_v6 = vand.u32 4294901760, %v1449_v0 }
 0x161   :  { %v1342_v8 = vpop.f32.mrf.mxu0  ;;  %v1033_v36 = vmax.f32 %v1029_v11, 0.0  ;;  %1480 = vmatpush.xpose.msra.mxu2 %v1479_v6  ;;  %1612 = vmatpush.xpose.msrb.mxu1 %v1479_v6  ;;  %v3019_v11 = vadd.s32 8, %v2909_v24 }
 0x162   :  { %v1343_v2 = vadd.f32 %v1342_v8, %v1319_v15  ;;  %v1529_v15 = vsub.f32 %v1449_v0, %v1479_v6  ;;  %v1370_v8 = vld [vmem:[%s3093_s2 + $0x10] sm:$0xff] }
 0x164   :  { %v1365_v4 = vadd.f32 %v1364_v54, %v1343_v2  ;;  %v1446_v2 = vsel %vm1436_vm12, %v1370_v8, 0  ;;  %v1530_v54 = vand.u32 4294901760, %v1529_v15  ;;  %1579 = vmatpush.xpose.msrb.mxu0 %v1529_v15 }
 0x166   :  { %v1367_v57 = vmax.f32 %v1365_v4, 0.0  ;;  %v1481_v4 = vand.u32 4294901760, %v1446_v2 }
 0x168   :  { %v1384_v13 = vperm.slane %v1367_v57, 1  ;;  %v1377_v23 = vperm.slane %v1367_v57, 0  ;;  %v1391_v52 = vperm.slane %v1367_v57, 2  ;;  %v1398_v5 = vperm.slane %v1367_v57, 3  ;;  %1482 = vmatpush.xpose.msra.mxu2 %v1481_v4  ;;  %1614 = vmatpush.xpose.msrb.mxu1 %v1481_v4 }
 0x169   :  { %v1531_v57 = vsub.f32 %v1529_v15, %v1530_v54 }
 0x16a   :  { %1389 = vperm.xlu1 %2037, %v1384_v13   ;;  %1382 = vperm.xlu0 %2036, %v1377_v23   ;;  %v1535_v13 = vsub.f32 %v1446_v2, %v1481_v4  ;;  %v1369_v23 = vld [vmem:[%s3093_s2 + $0x8] sm:$0xff] }
 0x16b   :  { %1396 = vperm.xlu2 %2038, %v1391_v52   ;;  %v1443_v52 = vsel %vm1436_vm12, %v1369_v23, 0  ;;  %v3030_v23 = vadd.s32 16, %v2909_v24 }
 0x16c   :  { %v1483_v44 = vand.u32 4294901760, %v1443_v52  ;;  %1582 = vmatpush.xpose.msrb.mxu0 %v1535_v13 }
 0x16e   :  { %1484 = vmatpush.xpose.msra.mxu2 %v1483_v44  ;;  %1616 = vmatpush.xpose.msrb.mxu1 %v1483_v44 }
 0x172   :  { %2041 = vset.pattern.permute.xlu0 %v2134_v30  ;;  %2039 = vset.pattern.permute.xlu1 %v2134_v30 }
 0x173   :  { %1403 = vperm.xlu2 %2038, %v1398_v5   ;;  %v1532_v5 = vand.u32 4294901760, %v1531_v57 }
 0x175   :  { %1533 = vmatpush.xpose.msra.mxu3 %v1532_v5  ;;  %v3036_v5 = vadd.s32 48, %v2909_v24 }
 0x178   :  { %v1022_v61 = vpop.xlane.xlu0 %1021 }
 0x179   :  { %v1030_v37 = vmul.f32 0.0078125, %v1022_v61 }
 0x17b   :  { %2040 = vset.pattern.permute.xlu2 %v2134_v30  ;;  %v1034_v56 = vmax.f32 %v1030_v37, 0.0  ;;  %v1536_v30 = vand.u32 4294901760, %v1535_v13  ;;  %v3022_v37 = vadd.s32 32, %v2909_v24 }
 0x194   :  { %v1025_v39 = vpop.xlane.xlu1 %1024 }
 0x195   :  { %v1031_v47 = vmul.f32 0.0078125, %v1025_v39 }
 0x197   :  { %v1035_v17 = vmax.f32 %v1031_v47, 0.0 }
 0x1a2   :  { %v1028_v42 = vpop.xlane.xlu2 %1027 }
 0x1a3   :  { %v1032_v26 = vmul.f32 0.0078125, %v1028_v42  ;;  %v1537_v42 = vsub.f32 %v1535_v13, %v1536_v30  ;;  %v3027_v13 = vadd.s32 24, %v2909_v24 }
 0x1a5   :  { %v1036_v20 = vmax.f32 %v1032_v26, 0.0  ;;  %v1368_v26 = vld [vmem:[%s3093_s2] sm:$0xff]  ;;  %v1538_v18 = vand.u32 4294901760, %v1537_v42  ;;  %s2135_s2 = smov [#allocation5]  }
 0x1a6   :  { %v1440_v41 = vsel %vm1436_vm12, %v1368_v26, 0  ;;  %v1915_v26 = vld [vmem:[#allocation2] sm:$0xff]  ;;  %s2015_s10 = sshll.u32 %s2135_s2, 4  ;;  %s2016_s10 = int_to_ptr.vmem [resolvable:$true] %s2015_s10 }
 0x1a7   :  { %v1485_v3 = vand.u32 4294901760, %v1440_v41  ;;  %1539 = vmatpush.xpose.msra.mxu3 %v1538_v18 }
 0x1a9   :  { %v1547_v1 = vsub.f32 %v1440_v41, %v1485_v3  ;;  %1486 = vmatpush.xpose.msra.mxu2 %v1485_v3  ;;  %1618 = vmatpush.xpose.msrb.mxu1 %v1485_v3 }
 0x1ab   :  { %v1548_v32 = vand.u32 4294901760, %v1547_v1 }
 0x1ad   :  { %1637 = vmatpush.xpose.msrb.mxu2 %v1506_v40 }
 0x1b1   :  { %1641 = vmatpush.xpose.msrb.mxu2 %v1512_v28 }
 0x1b5   :  { %1645 = vmatpush.xpose.msrb.mxu2 %v1518_v12 }
 0x1b9   :  { %1649 = vmatpush.xpose.msrb.mxu2 %v1524_v46 }
 0x1bd   :  { %1653 = vmatpush.xpose.msrb.mxu2 %v1530_v54 }
 0x1c1   :  { %1657 = vmatpush.xpose.msrb.mxu2 %v1536_v30  ;;  %v1752_v30 = vadd.s32 40, %v2909_v24 }
 0x1c5   :  { %v2914_v38 = vpop.permute.xlu2 %1396 }
 0x1c6   :  { %v1411_v49 = vadd.f32 %v2914_v38, %v1035_v17  ;;  %v1541_v38 = vsub.f32 %v1443_v52, %v1483_v44 }
 0x1c8   :  { %v1542_v63 = vand.u32 4294901760, %v1541_v38  ;;  %1585 = vmatpush.xpose.msrb.mxu0 %v1541_v38 }
 0x1ca   :  { %v1543_v43 = vsub.f32 %v1541_v38, %v1542_v63  ;;  %1661 = vmatpush.xpose.msrb.mxu2 %v1542_v63  ;;  %v1917_v63 = vld [vmem:[#allocation2 + $0x10] sm:$0xff] }
 0x1cc   :  { %v1544_v33 = vand.u32 4294901760, %v1543_v43  ;;  %1588 = vmatpush.xpose.msrb.mxu0 %v1547_v1 }
 0x1cd   :  { %v1404_v22 = vpop.permute.xlu2 %1403 }
 0x1ce   :  { %v1412_v34 = vadd.f32 %v1404_v22, %v1036_v20  ;;  %1545 = vmatpush.xpose.msra.mxu3 %v1544_v33  ;;  %v1549_v20 = vsub.f32 %v1547_v1, %v1548_v32  ;;  %1665 = vmatpush.xpose.msrb.mxu2 %v1548_v32  ;;  %v1916_v1 = vld [vmem:[#allocation2 + $0x8] sm:$0xff] }
 0x1d0   :  { %1427 = vperm.xlu0 %2041, %v1412_v34   ;;  %v1550_v22 = vand.u32 4294901760, %v1549_v20 }
 0x1d2   :  { %1551 = vmatpush.xpose.msra.mxu3 %v1550_v22 }
 0x1d6   :  { %1680 = vmatpush.xpose.msrb.mxu3 %v2931_v27 }
 0x1d8   :  { %2046 = vset.pattern.permute.xlu0 %v3022_v37 }
 0x1da   :  { %1682 = vmatpush.xpose.msrb.mxu3 %v2933_v10 }
 0x1dc   :  { %v1390_v29 = vpop.permute.xlu1 %1389  ;;  %v1383_v53 = vpop.permute.xlu0 %1382 }
 0x1dd   :  { %v1410_v51 = vadd.f32 %v1390_v29, %v1034_v56  ;;  %v1409_v62 = vadd.f32 %v1383_v53, %v1033_v36 }
 0x1de   :  { %1684 = vmatpush.xpose.msrb.mxu3 %v2935_v60 }
 0x1df   :  { %1421 = vperm.xlu2 %2040, %v1410_v51   ;;  %1418 = vperm.xlu1 %2039, %v1409_v62  }
 0x1e2   :  { %1686 = vmatpush.xpose.msrb.mxu3 %v2949_v59 }
 0x1e6   :  { %1688 = vmatpush.xpose.msrb.mxu3 %v1479_v6 }
 0x1e7   :  { %1424 = vperm.xlu1 %2039, %v1411_v49   ;;  %2042 = vset.pattern.permute.xlu2 %v2909_v24 }
 0x1ea   :  { %1690 = vmatpush.xpose.msrb.mxu3 %v1481_v4 }
 0x1ee   :  { %1692 = vmatpush.xpose.msrb.mxu3 %v1483_v44  ;;  %v3042_v44 = vadd.s32 56, %v2909_v24 }
 0x1ef   :  { %2043 = vset.pattern.permute.xlu1 %v3019_v11 }
 0x1f2   :  { %1694 = vmatpush.xpose.msrb.mxu3 %v1485_v3 }
 0x239   :  { %v1422_v58 = vpop.permute.xlu2 %1421 }
 0x23a   :  { %v1430_v14 = vperm.slane %v1422_v58, %v2604_v19 }
 0x242   :  { %v1428_v10 = vpop.permute.xlu0 %1427 }
 0x243   :  { %v1432_v28 = vperm.slane %v1428_v10, %v2604_v19  ;;  %v1924_v10 = vld [vmem:[#allocation2 + $0x48] sm:$0xff] }
 0x251   :  { %v1419_v27 = vpop.permute.xlu1 %1418 }
 0x252   :  { %v1429_v48 = vperm.slane %v1419_v27, %v2604_v19  ;;  %v1920_v27 = vld [vmem:[#allocation2 + $0x28] sm:$0xff] }
 0x254   :  { %v1433_v59 = vsel %vm1210_vm8, %v1430_v14, %v1429_v48  ;;  %v1918_v14 = vld [vmem:[#allocation2 + $0x18] sm:$0xff] }
 0x259   :  { %v1425_v40 = vpop.permute.xlu1 %1424 }
 0x25a   :  { %v1431_v60 = vperm.slane %v1425_v40, %v2604_v19 }
 0x25c   :  { %v1434_v34 = vsel %vm1212_vm9, %v1431_v60, %v1433_v59 }
 0x25d   :  { %v1435_v21 = vsel %vm1214_vm10, %v1432_v28, %v1434_v34  ;;  %v1922_v34 = vld [vmem:[#allocation2 + $0x38] sm:$0xff] }
 0x25e   :  { %v1437_v55 = vsel %vm1436_vm12, %v1435_v21, 0 }
 0x25f   :  { %v1487_v12 = vand.u32 4294901760, %v1437_v55 }
 0x261   :  { %1553 = vmatmul.f32.vlgmr.msra.gmra.mxu3 %v1487_v12  ;;  %v1488_v25 = vsub.f32 %v1437_v55, %v1487_v12 }
 0x263   :  { %1591 = vmatmul.f32.vlgmr.msrb.gmra.mxu0 %v1488_v25  ;;  %v1489_v35 = vand.u32 4294901760, %v1488_v25 }
 0x265   :  { %1622 = vmatmul.f32.vlgmr.msrb.gmra.mxu1 %v1489_v35  ;;  %v1490_v16 = vsub.f32 %v1488_v25, %v1489_v35  ;;  %v1921_v25 = vld [vmem:[#allocation2 + $0x30] sm:$0xff] }
 0x267   :  { %v1491_v31 = vand.u32 4294901760, %v1490_v16 }
 0x269   :  { %1492 = vmatmul.f32.vlgmr.msra.gmra.mxu2 %v1491_v31  ;;  %1696 = vmatmul.f32.vlgmr.msrb.gmra.mxu3 %v1487_v12 }
 0x271   :  { %1667 = vmatmul.f32.vlgmr.msrb.gmra.mxu2 %v1487_v12  ;;  %v1929_v12 = vld [vmem:[#allocation2 + $0x70] sm:$0xff] }
 0x2e0   :  { %v1592_v46 = vpop.f32.mrf.mxu0 }
 0x2e2   :  { %v1623_v45 = vpop.f32.mrf.mxu1 }
 0x2e4   :  { %v1554_v19 = vpop.f32.mrf.mxu3 }
 0x2ec   :  { %v1493_v61 = vpop.f32.mrf.mxu2  ;;  %v1697_v53 = vpop.f32.mrf.mxu3 }
 0x2ed   :  { %v1555_v39 = vadd.f32 %v1554_v19, %v1493_v61  ;;  %v1925_v61 = vld [vmem:[#allocation2 + $0x50] sm:$0xff] }
 0x2ef   :  { %v1593_v7 = vadd.f32 %v1592_v46, %v1555_v39 }
 0x2f1   :  { %v1624_v36 = vadd.f32 %v1623_v45, %v1593_v7  ;;  %v1934_v7 = vld [vmem:[#allocation2 + $0x98] sm:$0xff]  ;;  %v1923_v45 = vld [vmem:[#allocation2 + $0x40] sm:$0xff] }
 0x2f4   :  { %v1668_v56 = vpop.f32.mrf.mxu2 }
 0x2f5   :  { %v1669_v29 = vadd.f32 %v1668_v56, %v1624_v36 }
 0x2f7   :  { %v1698_v9 = vadd.f32 %v1697_v53, %v1669_v29 }
 0x2f9   :  { %v2030_v47 = vmul.f32 -1.442695, %v1698_v9 }
 0x2fb   :  { %2075 = vpow2.f32 %v2030_v47 }
 0x301   :  { %v2076_v51 = vpop.eup %2075 }
 0x302   :  { %v1703_v62 = vadd.f32 1.0, %v2076_v51  ;;  %v1939_v51 = vld [vmem:[#allocation2 + $0xc0] sm:$0xff] }
 0x304   :  { %2077 = vrcp.f32 %v1703_v62  ;;  %v1715_v0 = vand.u32 2147483648, %v1703_v62  ;;  %v1713_v15 = vand.u32 2147483647, %v1703_v62  ;;  %vm1709_vm14 = vweird.f32 %v1703_v62 }
 0x306   :  { %v1716_v2 = vor.u32 1.1754944e-38, %v1715_v0  ;;  %vm1714_vm0 = vcmp.eq.f32.partialorder %v1713_v15, 8.507059e+37 }
 0x30a   :  { %v2078_v17 = vpop.eup %2077 }
 0x30b   :  { %v1705_v49 = vmul.f32 %v2078_v17, %v1703_v62  ;;  %vm1710_vm13 = vweird.f32 %v2078_v17  ;;  %v1926_v62 = vld [vmem:[#allocation2 + $0x58] sm:$0xff] }
 0x30c   :  { %vm1711_vm15 = vmor %vm1709_vm14, %vm1710_vm13 }
 0x30d   :  { %v1706_v50 = vsub.f32 1.0, %v1705_v49 }
 0x30f   :  { %v1707_v6 = vmul.f32 %v2078_v17, %v1706_v50 }
 0x311   :  { %v1708_v8 = vadd.f32 %v2078_v17, %v1707_v6 }
 0x313   :  { %v1712_v54 = vsel %vm1711_vm15, %v2078_v17, %v1708_v8  ;;  %v1944_v8 = vld [vmem:[#allocation2 + $0xe8] sm:$0xff] }
 0x314   :  { %v1717_v4 = vsel %vm1714_vm0, %v1716_v2, %v1712_v54  ;;  %v1928_v2 = vld [vmem:[#allocation2 + $0x68] sm:$0xff] }
 0x315   :  { %v1719_v57 = vperm.slane %v1717_v4, 0  ;;  %v1768_v52 = vperm.slane %v1717_v4, 1  ;;  %v3047_v42 = vperm.slane %v1717_v4, 2  ;;  %v3053_v38 = vperm.slane %v1717_v4, 3 }
 0x317   :  { %1748 = vperm.xlu0 %2046, %v1719_v57   ;;  %1730 = vperm.xlu1 %2043, %v1719_v57  }
 0x318   :  { %1724 = vperm.xlu2 %2042, %v1719_v57  }
 0x31f   :  { %2051 = vset.pattern.permute.xlu0 %v3019_v11  ;;  %2045 = vset.pattern.permute.xlu1 %v3027_v13 }
 0x320   :  { %2044 = vset.pattern.permute.xlu2 %v3030_v23 }
 0x327   :  { %1779 = vperm.xlu0 %2051, %v1768_v52   ;;  %1742 = vperm.xlu1 %2045, %v1719_v57  }
 0x328   :  { %1736 = vperm.xlu2 %2044, %v1719_v57  }
 0x32f   :  { %2056 = vset.pattern.permute.xlu0 %v3036_v5  ;;  %2048 = vset.pattern.permute.xlu1 %v3036_v5 }
 0x330   :  { %2047 = vset.pattern.permute.xlu2 %v1752_v30 }
 0x337   :  { %1809 = vperm.xlu0 %2056, %v1768_v52   ;;  %1760 = vperm.xlu1 %2048, %v1719_v57  }
 0x338   :  { %1754 = vperm.xlu2 %2047, %v1719_v57  }
 0x33f   :  { %2061 = vset.pattern.permute.xlu0 %v3027_v13  ;;  %2050 = vset.pattern.permute.xlu1 %v2909_v24 }
 0x340   :  { %2049 = vset.pattern.permute.xlu2 %v3042_v44 }
 0x347   :  { %1840 = vperm.xlu0 %2061, %v3047_v42   ;;  %1773 = vperm.xlu1 %2050, %v1768_v52  }
 0x348   :  { %1766 = vperm.xlu2 %2049, %v1719_v57  }
 0x34f   :  { %2066 = vset.pattern.permute.xlu0 %v2909_v24  ;;  %2053 = vset.pattern.permute.xlu1 %v3027_v13 }
 0x350   :  { %2052 = vset.pattern.permute.xlu2 %v3030_v23 }
 0x357   :  { %1871 = vperm.xlu0 %2066, %v3053_v38   ;;  %1791 = vperm.xlu1 %2053, %v1768_v52  }
 0x358   :  { %1785 = vperm.xlu2 %2052, %v1768_v52  }
 0x35f   :  { %2071 = vset.pattern.permute.xlu0 %v1752_v30  ;;  %2055 = vset.pattern.permute.xlu1 %v1752_v30 }
 0x360   :  { %2054 = vset.pattern.permute.xlu2 %v3022_v37 }
 0x367   :  { %1901 = vperm.xlu0 %2071, %v3053_v38   ;;  %1803 = vperm.xlu1 %2055, %v1768_v52  }
 0x368   :  { %1797 = vperm.xlu2 %2054, %v1768_v52  }
 0x36f   :  { %2058 = vset.pattern.permute.xlu1 %v2909_v24  ;;  %2074 = vset.pattern.permute.xlu0 %v3042_v44  ;;  %v1919_v24 = vld [vmem:[#allocation2 + $0x20] sm:$0xff] }
 0x370   :  { %2057 = vset.pattern.permute.xlu2 %v3042_v44 }
 0x372   :  { %v1725_v41 = vpop.permute.xlu2 %1724 }
 0x373   :  { %v1947_v18 = vmul.f32 %v1915_v26, %v1725_v41  ;;  %v1935_v26 = vld [vmem:[#allocation2 + $0xa0] sm:$0xff] }
 0x375   :  { %1979 = vst [vmem:[#allocation5] sm:$0xff] %v1947_v18 }
 0x377   :  { %1822 = vperm.xlu1 %2058, %v3047_v42  }
 0x378   :  { %1815 = vperm.xlu2 %2057, %v1768_v52  }
 0x37f   :  { %2060 = vset.pattern.permute.xlu1 %v3030_v23 }
 0x380   :  { %2059 = vset.pattern.permute.xlu2 %v3019_v11 }
 0x382   :  { %v1737_v3 = vpop.permute.xlu2 %1736 }
 0x383   :  { %v1949_v43 = vmul.f32 %v1917_v63, %v1737_v3  ;;  %v1933_v63 = vld [vmem:[#allocation2 + $0x90] sm:$0xff] }
 0x385   :  { %1981 = vst [vmem:[#allocation5 + $0x10] sm:$0xff] %v1949_v43  ;;  %v1937_v43 = vld [vmem:[#allocation2 + $0xb0] sm:$0xff] }
 0x387   :  { %1834 = vperm.xlu1 %2060, %v3047_v42  }
 0x388   :  { %1828 = vperm.xlu2 %2059, %v3047_v42  }
 0x389   :  { %v1749_v33 = vpop.permute.xlu0 %1748  ;;  %v1731_v32 = vpop.permute.xlu1 %1730 }
 0x38a   :  { %v1951_v20 = vmul.f32 %v1919_v24, %v1749_v33  ;;  %v1948_v22 = vmul.f32 %v1916_v1, %v1731_v32  ;;  %v1936_v33 = vld [vmem:[#allocation2 + $0xa8] sm:$0xff] }
 0x38c   :  { %1983 = vst [vmem:[#allocation5 + $0x20] sm:$0xff] %v1951_v20 }
 0x38d   :  { %1980 = vst [vmem:[#allocation5 + $0x8] sm:$0xff] %v1948_v22  ;;  %v1940_v22 = vld [vmem:[#allocation2 + $0xc8] sm:$0xff] }
 0x38f   :  { %2063 = vset.pattern.permute.xlu1 %v1752_v30 }
 0x390   :  { %2062 = vset.pattern.permute.xlu2 %v3022_v37 }
 0x392   :  { %v1755_v58 = vpop.permute.xlu2 %1754 }
 0x393   :  { %v1952_v48 = vmul.f32 %v1920_v27, %v1755_v58 }
 0x395   :  { %1984 = vst [vmem:[#allocation5 + $0x28] sm:$0xff] %v1952_v48  ;;  %v1938_v48 = vld [vmem:[#allocation2 + $0xb8] sm:$0xff] }
 0x397   :  { %1852 = vperm.xlu1 %2063, %v3047_v42  }
 0x398   :  { %1846 = vperm.xlu2 %2062, %v3047_v42  }
 0x399   :  { %v1780_v40 = vpop.permute.xlu0 %1779  ;;  %v1743_v60 = vpop.permute.xlu1 %1742 }
 0x39a   :  { %v1956_v28 = vmul.f32 %v1924_v10, %v1780_v40  ;;  %v1950_v59 = vmul.f32 %v1918_v14, %v1743_v60  ;;  %v1942_v40 = vld [vmem:[#allocation2 + $0xd8] sm:$0xff] }
 0x39c   :  { %1988 = vst [vmem:[#allocation5 + $0x48] sm:$0xff] %v1956_v28 }
 0x39d   :  { %1982 = vst [vmem:[#allocation5 + $0x18] sm:$0xff] %v1950_v59  ;;  %v1941_v59 = vld [vmem:[#allocation2 + $0xd0] sm:$0xff] }
 0x39f   :  { %2065 = vset.pattern.permute.xlu1 %v3042_v44 }
 0x3a0   :  { %2064 = vset.pattern.permute.xlu2 %v3036_v5 }
 0x3a2   :  { %v1767_v21 = vpop.permute.xlu2 %1766 }
 0x3a3   :  { %v1954_v55 = vmul.f32 %v1922_v34, %v1767_v21 }
 0x3a5   :  { %1986 = vst [vmem:[#allocation5 + $0x38] sm:$0xff] %v1954_v55  ;;  %v1945_v55 = vld [vmem:[#allocation2 + $0xf0] sm:$0xff] }
 0x3a7   :  { %1864 = vperm.xlu1 %2065, %v3047_v42  }
 0x3a8   :  { %1858 = vperm.xlu2 %2064, %v3047_v42  }
 0x3a9   :  { %v1810_v35 = vpop.permute.xlu0 %1809  ;;  %v1761_v16 = vpop.permute.xlu1 %1760 }
 0x3aa   :  { %v1961_v31 = vmul.f32 %v1929_v12, %v1810_v35  ;;  %v1953_v19 = vmul.f32 %v1921_v25, %v1761_v16  ;;  %v1943_v35 = vld [vmem:[#allocation2 + $0xe0] sm:$0xff] }
 0x3ac   :  { %1993 = vst [vmem:[#allocation5 + $0x70] sm:$0xff] %v1961_v31 }
 0x3ad   :  { %1985 = vst [vmem:[#allocation5 + $0x30] sm:$0xff] %v1953_v19  ;;  %v1946_v19 = vld [vmem:[#allocation2 + $0xf8] sm:$0xff] }
 0x3af   :  { %2068 = vset.pattern.permute.xlu1 %v3030_v23  ;;  %v1932_v23 = vld [vmem:[#allocation2 + $0x88] sm:$0xff] }
 0x3b0   :  { %2067 = vset.pattern.permute.xlu2 %v3019_v11  ;;  %v1927_v11 = vld [vmem:[#allocation2 + $0x60] sm:$0xff] }
 0x3b2   :  { %v1786_v39 = vpop.permute.xlu2 %1785 }
 0x3b3   :  { %v1957_v46 = vmul.f32 %v1925_v61, %v1786_v39 }
 0x3b5   :  { %1989 = vst [vmem:[#allocation5 + $0x50] sm:$0xff] %v1957_v46 }
 0x3b7   :  { %1883 = vperm.xlu1 %2068, %v3053_v38  }
 0x3b8   :  { %1877 = vperm.xlu2 %2067, %v3053_v38  }
 0x3b9   :  { %v1841_v36 = vpop.permute.xlu0 %1840  ;;  %v1774_v56 = vpop.permute.xlu1 %1773 }
 0x3ba   :  { %v1966_v29 = vmul.f32 %v1934_v7, %v1841_v36  ;;  %v1955_v53 = vmul.f32 %v1923_v45, %v1774_v56 }
 0x3bc   :  { %1998 = vst [vmem:[#allocation5 + $0x98] sm:$0xff] %v1966_v29 }
 0x3bd   :  { %1987 = vst [vmem:[#allocation5 + $0x40] sm:$0xff] %v1955_v53 }
 0x3bf   :  { %2070 = vset.pattern.permute.xlu1 %v3022_v37  ;;  %v1930_v37 = vld [vmem:[#allocation2 + $0x78] sm:$0xff] }
 0x3c0   :  { %2069 = vset.pattern.permute.xlu2 %v3027_v13 }
 0x3c2   :  { %v1798_v9 = vpop.permute.xlu2 %1797 }
 0x3c3   :  { %v1959_v47 = vmul.f32 %v1927_v11, %v1798_v9 }
 0x3c5   :  { %1991 = vst [vmem:[#allocation5 + $0x60] sm:$0xff] %v1959_v47 }
 0x3c7   :  { %1895 = vperm.xlu1 %2070, %v3053_v38  }
 0x3c8   :  { %1889 = vperm.xlu2 %2069, %v3053_v38  }
 0x3c9   :  { %v1872_v17 = vpop.permute.xlu0 %1871  ;;  %v1792_v49 = vpop.permute.xlu1 %1791 }
 0x3ca   :  { %v1971_v50 = vmul.f32 %v1939_v51, %v1872_v17  ;;  %v1958_v0 = vmul.f32 %v1926_v62, %v1792_v49 }
 0x3cc   :  { %2003 = vst [vmem:[#allocation5 + $0xc0] sm:$0xff] %v1971_v50 }
 0x3cd   :  { %1990 = vst [vmem:[#allocation5 + $0x58] sm:$0xff] %v1958_v0 }
 0x3cf   :  { %2073 = vset.pattern.permute.xlu1 %v3042_v44 }
 0x3d0   :  { %2072 = vset.pattern.permute.xlu2 %v3036_v5  ;;  %v1931_v5 = vld [vmem:[#allocation2 + $0x80] sm:$0xff] }
 0x3d2   :  { %v1816_v6 = vpop.permute.xlu2 %1815 }
 0x3d3   :  { %v1962_v15 = vmul.f32 %v1930_v37, %v1816_v6 }
 0x3d5   :  { %1994 = vst [vmem:[#allocation5 + $0x78] sm:$0xff] %v1962_v15 }
 0x3d7   :  { %1913 = vperm.xlu1 %2073, %v3053_v38  }
 0x3d8   :  { %1907 = vperm.xlu2 %2072, %v3053_v38  }
 0x3d9   :  { %v1902_v54 = vpop.permute.xlu0 %1901  ;;  %v1804_v4 = vpop.permute.xlu1 %1803 }
 0x3da   :  { %v1976_v57 = vmul.f32 %v1944_v8, %v1902_v54  ;;  %v1960_v13 = vmul.f32 %v1928_v2, %v1804_v4 }
 0x3dc   :  { %2008 = vst [vmem:[#allocation5 + $0xe8] sm:$0xff] %v1976_v57 }
 0x3dd   :  { %1992 = vst [vmem:[#allocation5 + $0x68] sm:$0xff] %v1960_v13 }
 0x3e2   :  { %v1829_v52 = vpop.permute.xlu2 %1828 }
 0x3e3   :  { %v1964_v30 = vmul.f32 %v1932_v23, %v1829_v52 }
 0x3e5   :  { %1996 = vst [vmem:[#allocation5 + $0x88] sm:$0xff] %v1964_v30 }
 0x3e9   :  { %v1823_v44 = vpop.permute.xlu1 %1822 }
 0x3ea   :  { %v1963_v42 = vmul.f32 %v1931_v5, %v1823_v44 }
 0x3ec   :  { %1995 = vst [vmem:[#allocation5 + $0x80] sm:$0xff] %v1963_v42 }
 0x3f2   :  { %v1847_v41 = vpop.permute.xlu2 %1846 }
 0x3f3   :  { %v1967_v18 = vmul.f32 %v1935_v26, %v1847_v41 }
 0x3f5   :  { %1999 = vst [vmem:[#allocation5 + $0xa0] sm:$0xff] %v1967_v18 }
 0x3f9   :  { %v1835_v38 = vpop.permute.xlu1 %1834 }
 0x3fa   :  { %v1965_v3 = vmul.f32 %v1933_v63, %v1835_v38 }
 0x3fc   :  { %1997 = vst [vmem:[#allocation5 + $0x90] sm:$0xff] %v1965_v3 }
 0x402   :  { %v1859_v24 = vpop.permute.xlu2 %1858 }
 0x403   :  { %v1969_v1 = vmul.f32 %v1937_v43, %v1859_v24 }
 0x405   :  { %2001 = vst [vmem:[#allocation5 + $0xb0] sm:$0xff] %v1969_v1 }
 0x409   :  { %v1853_v32 = vpop.permute.xlu1 %1852 }
 0x40a   :  { %v1968_v20 = vmul.f32 %v1936_v33, %v1853_v32 }
 0x40c   :  { %2000 = vst [vmem:[#allocation5 + $0xa8] sm:$0xff] %v1968_v20 }
 0x412   :  { %v1878_v27 = vpop.permute.xlu2 %1877 }
 0x413   :  { %v1972_v58 = vmul.f32 %v1940_v22, %v1878_v27 }
 0x415   :  { %2004 = vst [vmem:[#allocation5 + $0xc8] sm:$0xff] %v1972_v58 }
 0x419   :  { %v1865_v10 = vpop.permute.xlu1 %1864 }
 0x41a   :  { %v1970_v14 = vmul.f32 %v1938_v48, %v1865_v10 }
 0x41c   :  { %2002 = vst [vmem:[#allocation5 + $0xb8] sm:$0xff] %v1970_v14 }
 0x422   :  { %v1890_v60 = vpop.permute.xlu2 %1889 }
 0x423   :  { %v1974_v28 = vmul.f32 %v1942_v40, %v1890_v60 }
 0x425   :  { %2006 = vst [vmem:[#allocation5 + $0xd8] sm:$0xff] %v1974_v28 }
 0x429   :  { %v1884_v34 = vpop.permute.xlu1 %1883 }
 0x42a   :  { %v1973_v21 = vmul.f32 %v1941_v59, %v1884_v34 }
 0x42c   :  { %2005 = vst [vmem:[#allocation5 + $0xd0] sm:$0xff] %v1973_v21 }
 0x432   :  { %v1908_v12 = vpop.permute.xlu2 %1907 }
 0x433   :  { %v1977_v25 = vmul.f32 %v1945_v55, %v1908_v12 }
 0x435   :  { %2009 = vst [vmem:[#allocation5 + $0xf0] sm:$0xff] %v1977_v25 }
 0x439   :  { %v1896_v16 = vpop.permute.xlu1 %1895 }
 0x43a   :  { %v1975_v31 = vmul.f32 %v1943_v35, %v1896_v16 }
 0x43c   :  { %2007 = vst [vmem:[#allocation5 + $0xe0] sm:$0xff] %v1975_v31 }
 0x449   :  { %v1914_v61 = vpop.permute.xlu1 %1913 }
 0x44a   :  { %v1978_v39 = vmul.f32 %v1946_v19, %v1914_v61 }
 0x44c   :  { %2010 = vst [vmem:[#allocation5 + $0xf8] sm:$0xff] %v1978_v39 }
 0x44d   :  { %2023 = dma.vmem_to_hbm [thread:$0]  %s2016_s10, 4096, %s2018_s13, [#allocation4], %s2132_s17, %s2132_s17, %s2133_s18  }
 0x44e   :  { %2129 = dma.done.wait [#allocation4], 4096  }
 0x44f   :  { %2130 = vsyncadd [#allocation4], 4294963200 }
 0x450   :  { %2028 = vsyncpa [#allocation3], 1 }
 0x451   :  { %2029 = vsyncpa [#allocation4], 1 }

</bundles_post_ra>
